<compile_context>
chip_gen: v7x
topology: tpu7x:2x2x1
jax: 0.10.0
libtpu: 0.0.40
codegen_flags: <defaults>
</compile_context>

<pallas_src>
import functools

import jax
import jax.numpy as jnp
from jax.experimental import pallas as pl
from jax.experimental.pallas import tpu as pltpu

B_FEATS = 101      # "b" in the PyTorch module (spectral bands)
Z_DIM = 16
BN_EPS = 1e-5


# --------------------------------------------------------------------------
# Kernel
# --------------------------------------------------------------------------
def _vaefc_kernel(x_ref, eps_ref, w512_ref, w256_ref, w128_ref, vec_ref,
                  out_ref):
    n = x_ref.shape[0]
    inv_n = jnp.float32(1.0 / n)

    def mm(h_bf16, w):
        # bf16 MXU operands, f32 accumulation.
        return jnp.dot(h_bf16, w, preferred_element_type=jnp.float32)

    def bn_relu(h, vec_row, width):
        # h: f32 matmul accumulator.  BN folded into a per-column affine,
        # statistics in one pass (biased / training mode).  Padded lanes have
        # gamma = beta = 0 -> scale = shift = 0 -> output stays 0.
        gamma = vec_ref[vec_row:vec_row + 1, :width]
        beta = vec_ref[vec_row + 1:vec_row + 2, :width]
        s = jnp.sum(h, axis=0, keepdims=True)
        ssq = jnp.sum(h * h, axis=0, keepdims=True)
        mean = s * inv_n
        var = jnp.maximum(ssq * inv_n - mean * mean, 0.0)
        scale = gamma * jax.lax.rsqrt(var + BN_EPS)
        shift = beta - mean * scale
        return jnp.maximum(h * scale + shift, 0.0).astype(jnp.bfloat16)

    x = x_ref[...]                                        # (n, 128) bf16, lanes >= 101 are 0

    # ------------------------- encoder (fc1) -------------------------
    # Linear biases omitted: cancelled exactly by the BN mean subtraction.
    h = bn_relu(mm(x, w512_ref[0:128, :]), 0, 512)        # Linear(101->400) + BN + ReLU
    h = bn_relu(mm(h, w256_ref[0:512, :]), 2, 256)        # Linear(400->256) + BN + ReLU
    h1 = bn_relu(mm(h, w128_ref[0:256, :]), 4, 128)       # Linear(256->128) + BN + ReLU
    # (the extra F.relu in encode() is idempotent after ReLU)

    # fused fc2_mean / fc2_logvar: lanes [0:128) -> mu, [128:256) -> logvar
    head = mm(h1, w256_ref[640:768, :]) + vec_ref[6:7, 0:256]
    mu = head[:, 0:128]
    logvar = head[:, 128:256]

    # ----------------------- reparametrization -----------------------
    # NOTE: the module really computes std = 0.5 * exp(logvar).
    std = 0.5 * jnp.exp(logvar)
    z = eps_ref[...] * std + mu                           # (n, 128) f32; lanes >= z_dim stay 0
    z_bf16 = z.astype(jnp.bfloat16)

    # ------------------------- decoder (fc3) -------------------------
    h = bn_relu(mm(z_bf16, w128_ref[256:384, :]), 7, 128)  # Linear(z->128)   + BN + ReLU
    h = bn_relu(mm(h, w256_ref[512:640, :]), 9, 256)       # Linear(128->256) + BN + ReLU
    h3 = bn_relu(mm(h, w512_ref[128:384, :]), 11, 512)     # Linear(256->400) + BN + ReLU

    recon = jax.nn.sigmoid(mm(h3, w128_ref[384:896, :]) + vec_ref[13:14, 0:128])

    # Single lane-dense (n, 256) output slab: recon in lanes [0:128), z in [128:256).
    out_ref[:, 0:128] = recon
    out_ref[:, 128:256] = z


# --------------------------------------------------------------------------
# Parameters (synthetic, PyTorch-equivalent layout: Linear weight as (in, out))
# --------------------------------------------------------------------------
def make_params(key, z_dim=Z_DIM):
    dims = {
        "1": (B_FEATS, 400), "2": (400, 256), "3": (256, 128),
        "m": (128, z_dim), "v": (128, z_dim),
        "4": (z_dim, 128), "5": (128, 256), "6": (256, 400),
        "7": (400, B_FEATS),
    }
    keys = jax.random.split(key, 30)
    ki = iter(range(30))
    p = {}
    for name, (din, dout) in dims.items():
        p["w" + name] = jax.random.normal(keys[next(ki)], (din, dout), jnp.float32) * 0.05
        p["b" + name] = jax.random.normal(keys[next(ki)], (dout,), jnp.float32) * 0.02
    for name, d in [("1", 400), ("2", 256), ("3", 128),
                    ("4", 128), ("5", 256), ("6", 400)]:
        p["g" + name] = 1.0 + 0.1 * jax.random.normal(keys[next(ki)], (d,), jnp.float32)
        p["be" + name] = 0.05 * jax.random.normal(keys[next(ki)], (d,), jnp.float32)
    return p


def pack_params(p, z_dim=Z_DIM):
    """Pack all parameters into 3 bf16 weight slabs + 1 f32 vector slab."""
    assert z_dim <= 128
    bf16 = jnp.bfloat16

    def pad2(w, rows, cols):
        return jnp.pad(w, ((0, rows - w.shape[0]), (0, cols - w.shape[1])))

    # Weight slabs grouped by lane-padded output width (row offsets all 128-aligned).
    w512 = jnp.concatenate(
        [pad2(p["w1"], 128, 512), pad2(p["w6"], 256, 512)], axis=0).astype(bf16)

    w_head = jnp.zeros((128, 256), jnp.float32)
    w_head = w_head.at[:, :z_dim].set(p["wm"]).at[:, 128:128 + z_dim].set(p["wv"])
    w256 = jnp.concatenate(
        [pad2(p["w2"], 512, 256), pad2(p["w5"], 128, 256), w_head], axis=0).astype(bf16)

    w128 = jnp.concatenate(
        [pad2(p["w3"], 256, 128), pad2(p["w4"], 128, 128), pad2(p["w7"], 512, 128)],
        axis=0).astype(bf16)

    # f32 vector slab: one 512-lane row per vector.  Linear biases b1..b6 are
    # intentionally NOT packed: BN's mean subtraction cancels them exactly.
    # (Only valid because every such Linear feeds a training-mode BN over the
    #  same batch; do not reuse this packing for eval-mode / running stats.)
    def row(v):
        v = jnp.ravel(v)
        return jnp.pad(v, (0, 512 - v.shape[0]))

    b_head = jnp.zeros((512,), jnp.float32)
    b_head = b_head.at[:z_dim].set(p["bm"]).at[128:128 + z_dim].set(p["bv"])

    rows = [
        row(p["g1"]), row(p["be1"]),      # 0, 1
        row(p["g2"]), row(p["be2"]),      # 2, 3
        row(p["g3"]), row(p["be3"]),      # 4, 5
        b_head,                           # 6
        row(p["g4"]), row(p["be4"]),      # 7, 8
        row(p["g5"]), row(p["be5"]),      # 9, 10
        row(p["g6"]), row(p["be6"]),      # 11, 12
        row(p["b7"]),                     # 13
        jnp.zeros((512,), jnp.float32), jnp.zeros((512,), jnp.float32),  # pad rows
    ]
    vecs = jnp.stack(rows, axis=0)        # (16, 512) f32
    return w512, w256, w128, vecs


# --------------------------------------------------------------------------
# VMEM budgeting (generation-aware)
# --------------------------------------------------------------------------
def _vmem_cap_bytes():
    try:
        info = pltpu.get_tpu_info()
        cap = getattr(info, "vmem_capacity_bytes", None)
        if cap:
            return int(cap)
    except Exception:
        pass
    return 64 << 20   # conservative fallback = v7x per-TC VMEM


def _vmem_limit_for_batch(n):
    # Peak live set:  ~1.1 MiB packed weights  +  per-row activations.
    # Per row (bytes): x bf16 256, eps f32 512, out f32 1024, widest f32 matmul
    # accumulator (512 lanes) 2048, bf16 activation slabs (512+256+128 lanes)
    # ~1.8K, head/z f32 ~1.5K  ->  budget 8 KiB/row with headroom.
    est = (2 << 20) + n * 8192
    cap = int(0.85 * _vmem_cap_bytes())
    return max(8 << 20, min(cap, est))


# --------------------------------------------------------------------------
# Forward wrapper
# --------------------------------------------------------------------------
@functools.partial(jax.jit, static_argnames=("z_dim",))
def vaefc_forward(x, eps, packed, z_dim=Z_DIM):
    w512, w256, w128, vecs = packed
    n = x.shape[0]
    # x goes straight to a bf16 MXU operand -> cast wrapper-side (identical numerics).
    x_pad = jnp.pad(x.astype(jnp.bfloat16), ((0, 0), (0, 128 - x.shape[1])))
    eps_pad = jnp.pad(eps.astype(jnp.float32), ((0, 0), (0, 128 - z_dim)))

    vmem_spec = pl.BlockSpec(memory_space=pltpu.MemorySpace.VMEM)

    out = pl.pallas_call(
        _vaefc_kernel,
        out_shape=jax.ShapeDtypeStruct((n, 256), jnp.float32),   # [recon | z], lane-dense
        in_specs=[vmem_spec] * 6,
        out_specs=vmem_spec,
        compiler_params=pltpu.CompilerParams(
            vmem_limit_bytes=_vmem_limit_for_batch(n)),
    )(x_pad, eps_pad, w512, w256, w128, vecs)

    return out[:, :B_FEATS], out[:, 128:128 + z_dim]


# --------------------------------------------------------------------------
# Pure-JAX reference (module structure, biases included, bf16 matmul operands)
# --------------------------------------------------------------------------
def vaefc_reference(x, eps, p, z_dim=Z_DIM):
    def mm(h, w, b):
        return jnp.dot(h.astype(jnp.bfloat16), w.astype(jnp.bfloat16),
                       preferred_element_type=jnp.float32) + b

    def bn_relu(h, g, be):
        mean = jnp.mean(h, axis=0, keepdims=True)
        var = jnp.maximum(jnp.mean(h * h, axis=0, keepdims=True) - mean * mean, 0.0)
        hn = (h - mean) * jax.lax.rsqrt(var + BN_EPS)
        return jnp.maximum(hn * g + be, 0.0)

    h = bn_relu(mm(x, p["w1"], p["b1"]), p["g1"], p["be1"])
    h = bn_relu(mm(h, p["w2"], p["b2"]), p["g2"], p["be2"])
    h1 = bn_relu(mm(h, p["w3"], p["b3"]), p["g3"], p["be3"])
    mu = mm(h1, p["wm"], p["bm"])
    logvar = mm(h1, p["wv"], p["bv"])
    std = 0.5 * jnp.exp(logvar)
    z = eps * std + mu
    h = bn_relu(mm(z, p["w4"], p["b4"]), p["g4"], p["be4"])
    h = bn_relu(mm(h, p["w5"], p["b5"]), p["g5"], p["be5"])
    h3 = bn_relu(mm(h, p["w6"], p["b6"]), p["g6"], p["be6"])
    recon = jax.nn.sigmoid(mm(h3, p["w7"], p["b7"]))
    return recon, z


if __name__ == "__main__":
    key = jax.random.PRNGKey(0)
    k_param, k_x, k_eps = jax.random.split(key, 3)

    batch = 8
    x = jax.random.normal(k_x, (batch, B_FEATS), jnp.float32)
    # torch.randn in reparametrization is replaced by a deterministic eps input.
    eps = jax.random.normal(k_eps, (batch, Z_DIM), jnp.float32)

    params = make_params(k_param, Z_DIM)
    packed = pack_params(params, Z_DIM)

    recon, z = vaefc_forward(x, eps, packed, z_dim=Z_DIM)
    jax.block_until_ready((recon, z))

    assert recon.shape == (batch, B_FEATS) and z.shape == (batch, Z_DIM)
    assert bool(jnp.all(jnp.isfinite(recon))) and bool(jnp.all(jnp.isfinite(z)))
    assert bool(jnp.all(recon >= 0.0)) and bool(jnp.all(recon <= 1.0))

    # Correctness vs. pure-JAX reference (loose tolerance: bias-dropping /
    # padding / BN-affine folding are exact; residual differences are
    # bf16/reduction-order noise).
    recon_ref, z_ref = vaefc_reference(x, eps, params, Z_DIM)
    assert bool(jnp.max(jnp.abs(recon - recon_ref)) < 5e-2)
    assert bool(jnp.max(jnp.abs(z - z_ref)) < 5e-2)

    print("KERNEL_OK")
</pallas_src>

<mosaic_0001>
module attributes {stable_mosaic.version = 11 : i64} {
  func.func @_vaefc_kernel(%arg0: memref<8x128xbf16, #tpu.memory_space<vmem>>, %arg1: memref<8x128xf32, #tpu.memory_space<vmem>>, %arg2: memref<384x512xbf16, #tpu.memory_space<vmem>>, %arg3: memref<768x256xbf16, #tpu.memory_space<vmem>>, %arg4: memref<896x128xbf16, #tpu.memory_space<vmem>>, %arg5: memref<16x512xf32, #tpu.memory_space<vmem>>, %arg6: memref<8x256xf32, #tpu.memory_space<vmem>>) attributes {dimension_semantics = [], scalar_prefetch = 0 : i64, scratch_operands = 0 : i64, tpu.core_type = #tpu.core_type<tc>} {
    %c0 = arith.constant 0 : index
    %c0_0 = arith.constant 0 : index
    %0 = vector.load %arg0[%c0, %c0_0] : memref<8x128xbf16, #tpu.memory_space<vmem>>, vector<8x128xbf16>
    %c0_1 = arith.constant 0 : index
    %c0_2 = arith.constant 0 : index
    %1 = vector.load %arg2[%c0_1, %c0_2] : memref<384x512xbf16, #tpu.memory_space<vmem>>, vector<128x512xbf16>
    %cst = arith.constant dense<0.000000e+00> : vector<8x512xf32>
    %2 = tpu.matmul %0, %1, %cst {dimension_numbers = #tpu.dot_dimension_numbers<[1], [0], [0], [1], [0, 0, 1, 1], [], []>} : vector<8x128xbf16>, vector<128x512xbf16>, vector<8x512xf32> -> vector<8x512xf32>
    %c0_3 = arith.constant 0 : index
    %c0_4 = arith.constant 0 : index
    %3 = vector.load %arg5[%c0_3, %c0_4] : memref<16x512xf32, #tpu.memory_space<vmem>>, vector<1x512xf32>
    %c1 = arith.constant 1 : index
    %c0_5 = arith.constant 0 : index
    %4 = vector.load %arg5[%c1, %c0_5] : memref<16x512xf32, #tpu.memory_space<vmem>>, vector<1x512xf32>
    %cst_6 = arith.constant dense<0.000000e+00> : vector<512xf32>
    %5 = vector.multi_reduction <add>, %2, %cst_6 [0] : vector<8x512xf32> to vector<512xf32>
    %6 = vector.shape_cast %5 : vector<512xf32> to vector<1x512xf32>
    %7 = arith.mulf %2, %2 : vector<8x512xf32>
    %cst_7 = arith.constant dense<0.000000e+00> : vector<512xf32>
    %8 = vector.multi_reduction <add>, %7, %cst_7 [0] : vector<8x512xf32> to vector<512xf32>
    %9 = vector.shape_cast %8 : vector<512xf32> to vector<1x512xf32>
    %cst_8 = arith.constant 1.250000e-01 : f32
    %10 = vector.broadcast %cst_8 : f32 to vector<1x512xf32>
    %11 = arith.mulf %6, %10 : vector<1x512xf32>
    %cst_9 = arith.constant 1.250000e-01 : f32
    %12 = vector.broadcast %cst_9 : f32 to vector<1x512xf32>
    %13 = arith.mulf %9, %12 : vector<1x512xf32>
    %14 = arith.mulf %11, %11 : vector<1x512xf32>
    %15 = arith.subf %13, %14 : vector<1x512xf32>
    %cst_10 = arith.constant 0.000000e+00 : f32
    %16 = vector.broadcast %cst_10 : f32 to vector<1x512xf32>
    %17 = arith.maximumf %15, %16 : vector<1x512xf32>
    %cst_11 = arith.constant 9.99999974E-6 : f32
    %18 = vector.broadcast %cst_11 : f32 to vector<1x512xf32>
    %19 = arith.addf %17, %18 : vector<1x512xf32>
    %20 = math.rsqrt %19 : vector<1x512xf32>
    %21 = arith.mulf %3, %20 : vector<1x512xf32>
    %22 = arith.mulf %11, %21 : vector<1x512xf32>
    %23 = arith.subf %4, %22 : vector<1x512xf32>
    %24 = vector.broadcast %21 : vector<1x512xf32> to vector<8x512xf32>
    %25 = arith.mulf %2, %24 : vector<8x512xf32>
    %26 = vector.broadcast %23 : vector<1x512xf32> to vector<8x512xf32>
    %27 = arith.addf %25, %26 : vector<8x512xf32>
    %cst_12 = arith.constant 0.000000e+00 : f32
    %28 = vector.broadcast %cst_12 : f32 to vector<8x512xf32>
    %29 = arith.maximumf %27, %28 : vector<8x512xf32>
    %30 = arith.truncf %29 : vector<8x512xf32> to vector<8x512xbf16>
    %c0_13 = arith.constant 0 : index
    %c0_14 = arith.constant 0 : index
    %31 = vector.load %arg3[%c0_13, %c0_14] : memref<768x256xbf16, #tpu.memory_space<vmem>>, vector<512x256xbf16>
    %cst_15 = arith.constant dense<0.000000e+00> : vector<8x256xf32>
    %32 = tpu.matmul %30, %31, %cst_15 {dimension_numbers = #tpu.dot_dimension_numbers<[1], [0], [0], [1], [0, 0, 1, 1], [], []>} : vector<8x512xbf16>, vector<512x256xbf16>, vector<8x256xf32> -> vector<8x256xf32>
    %c2 = arith.constant 2 : index
    %c0_16 = arith.constant 0 : index
    %33 = vector.load %arg5[%c2, %c0_16] : memref<16x512xf32, #tpu.memory_space<vmem>>, vector<1x256xf32>
    %c3 = arith.constant 3 : index
    %c0_17 = arith.constant 0 : index
    %34 = vector.load %arg5[%c3, %c0_17] : memref<16x512xf32, #tpu.memory_space<vmem>>, vector<1x256xf32>
    %cst_18 = arith.constant dense<0.000000e+00> : vector<256xf32>
    %35 = vector.multi_reduction <add>, %32, %cst_18 [0] : vector<8x256xf32> to vector<256xf32>
    %36 = vector.shape_cast %35 : vector<256xf32> to vector<1x256xf32>
    %37 = arith.mulf %32, %32 : vector<8x256xf32>
    %cst_19 = arith.constant dense<0.000000e+00> : vector<256xf32>
    %38 = vector.multi_reduction <add>, %37, %cst_19 [0] : vector<8x256xf32> to vector<256xf32>
    %39 = vector.shape_cast %38 : vector<256xf32> to vector<1x256xf32>
    %cst_20 = arith.constant 1.250000e-01 : f32
    %40 = vector.broadcast %cst_20 : f32 to vector<1x256xf32>
    %41 = arith.mulf %36, %40 : vector<1x256xf32>
    %cst_21 = arith.constant 1.250000e-01 : f32
    %42 = vector.broadcast %cst_21 : f32 to vector<1x256xf32>
    %43 = arith.mulf %39, %42 : vector<1x256xf32>
    %44 = arith.mulf %41, %41 : vector<1x256xf32>
    %45 = arith.subf %43, %44 : vector<1x256xf32>
    %cst_22 = arith.constant 0.000000e+00 : f32
    %46 = vector.broadcast %cst_22 : f32 to vector<1x256xf32>
    %47 = arith.maximumf %45, %46 : vector<1x256xf32>
    %cst_23 = arith.constant 9.99999974E-6 : f32
    %48 = vector.broadcast %cst_23 : f32 to vector<1x256xf32>
    %49 = arith.addf %47, %48 : vector<1x256xf32>
    %50 = math.rsqrt %49 : vector<1x256xf32>
    %51 = arith.mulf %33, %50 : vector<1x256xf32>
    %52 = arith.mulf %41, %51 : vector<1x256xf32>
    %53 = arith.subf %34, %52 : vector<1x256xf32>
    %54 = vector.broadcast %51 : vector<1x256xf32> to vector<8x256xf32>
    %55 = arith.mulf %32, %54 : vector<8x256xf32>
    %56 = vector.broadcast %53 : vector<1x256xf32> to vector<8x256xf32>
    %57 = arith.addf %55, %56 : vector<8x256xf32>
    %cst_24 = arith.constant 0.000000e+00 : f32
    %58 = vector.broadcast %cst_24 : f32 to vector<8x256xf32>
    %59 = arith.maximumf %57, %58 : vector<8x256xf32>
    %60 = arith.truncf %59 : vector<8x256xf32> to vector<8x256xbf16>
    %c0_25 = arith.constant 0 : index
    %c0_26 = arith.constant 0 : index
    %61 = vector.load %arg4[%c0_25, %c0_26] : memref<896x128xbf16, #tpu.memory_space<vmem>>, vector<256x128xbf16>
    %cst_27 = arith.constant dense<0.000000e+00> : vector<8x128xf32>
    %62 = tpu.matmul %60, %61, %cst_27 {dimension_numbers = #tpu.dot_dimension_numbers<[1], [0], [0], [1], [0, 0, 1, 1], [], []>} : vector<8x256xbf16>, vector<256x128xbf16>, vector<8x128xf32> -> vector<8x128xf32>
    %c4 = arith.constant 4 : index
    %c0_28 = arith.constant 0 : index
    %63 = vector.load %arg5[%c4, %c0_28] : memref<16x512xf32, #tpu.memory_space<vmem>>, vector<1x128xf32>
    %c5 = arith.constant 5 : index
    %c0_29 = arith.constant 0 : index
    %64 = vector.load %arg5[%c5, %c0_29] : memref<16x512xf32, #tpu.memory_space<vmem>>, vector<1x128xf32>
    %cst_30 = arith.constant dense<0.000000e+00> : vector<128xf32>
    %65 = vector.multi_reduction <add>, %62, %cst_30 [0] : vector<8x128xf32> to vector<128xf32>
    %66 = vector.shape_cast %65 : vector<128xf32> to vector<1x128xf32>
    %67 = arith.mulf %62, %62 : vector<8x128xf32>
    %cst_31 = arith.constant dense<0.000000e+00> : vector<128xf32>
    %68 = vector.multi_reduction <add>, %67, %cst_31 [0] : vector<8x128xf32> to vector<128xf32>
    %69 = vector.shape_cast %68 : vector<128xf32> to vector<1x128xf32>
    %cst_32 = arith.constant 1.250000e-01 : f32
    %70 = vector.broadcast %cst_32 : f32 to vector<1x128xf32>
    %71 = arith.mulf %66, %70 : vector<1x128xf32>
    %cst_33 = arith.constant 1.250000e-01 : f32
    %72 = vector.broadcast %cst_33 : f32 to vector<1x128xf32>
    %73 = arith.mulf %69, %72 : vector<1x128xf32>
    %74 = arith.mulf %71, %71 : vector<1x128xf32>
    %75 = arith.subf %73, %74 : vector<1x128xf32>
    %cst_34 = arith.constant 0.000000e+00 : f32
    %76 = vector.broadcast %cst_34 : f32 to vector<1x128xf32>
    %77 = arith.maximumf %75, %76 : vector<1x128xf32>
    %cst_35 = arith.constant 9.99999974E-6 : f32
    %78 = vector.broadcast %cst_35 : f32 to vector<1x128xf32>
    %79 = arith.addf %77, %78 : vector<1x128xf32>
    %80 = math.rsqrt %79 : vector<1x128xf32>
    %81 = arith.mulf %63, %80 : vector<1x128xf32>
    %82 = arith.mulf %71, %81 : vector<1x128xf32>
    %83 = arith.subf %64, %82 : vector<1x128xf32>
    %84 = vector.broadcast %81 : vector<1x128xf32> to vector<8x128xf32>
    %85 = arith.mulf %62, %84 : vector<8x128xf32>
    %86 = vector.broadcast %83 : vector<1x128xf32> to vector<8x128xf32>
    %87 = arith.addf %85, %86 : vector<8x128xf32>
    %cst_36 = arith.constant 0.000000e+00 : f32
    %88 = vector.broadcast %cst_36 : f32 to vector<8x128xf32>
    %89 = arith.maximumf %87, %88 : vector<8x128xf32>
    %90 = arith.truncf %89 : vector<8x128xf32> to vector<8x128xbf16>
    %c640 = arith.constant 640 : index
    %c0_37 = arith.constant 0 : index
    %91 = vector.load %arg3[%c640, %c0_37] : memref<768x256xbf16, #tpu.memory_space<vmem>>, vector<128x256xbf16>
    %cst_38 = arith.constant dense<0.000000e+00> : vector<8x256xf32>
    %92 = tpu.matmul %90, %91, %cst_38 {dimension_numbers = #tpu.dot_dimension_numbers<[1], [0], [0], [1], [0, 0, 1, 1], [], []>} : vector<8x128xbf16>, vector<128x256xbf16>, vector<8x256xf32> -> vector<8x256xf32>
    %c6 = arith.constant 6 : index
    %c0_39 = arith.constant 0 : index
    %93 = vector.load %arg5[%c6, %c0_39] : memref<16x512xf32, #tpu.memory_space<vmem>>, vector<1x256xf32>
    %94 = vector.broadcast %93 : vector<1x256xf32> to vector<8x256xf32>
    %95 = arith.addf %92, %94 : vector<8x256xf32>
    %96 = vector.extract_strided_slice %95 {offsets = [0, 0], sizes = [8, 128], strides = [1, 1]} : vector<8x256xf32> to vector<8x128xf32>
    %97 = vector.extract_strided_slice %95 {offsets = [0, 128], sizes = [8, 128], strides = [1, 1]} : vector<8x256xf32> to vector<8x128xf32>
    %98 = math.exp %97 : vector<8x128xf32>
    %cst_40 = arith.constant 5.000000e-01 : f32
    %99 = vector.broadcast %cst_40 : f32 to vector<8x128xf32>
    %100 = arith.mulf %99, %98 : vector<8x128xf32>
    %c0_41 = arith.constant 0 : index
    %c0_42 = arith.constant 0 : index
    %101 = vector.load %arg1[%c0_41, %c0_42] : memref<8x128xf32, #tpu.memory_space<vmem>>, vector<8x128xf32>
    %102 = arith.mulf %101, %100 : vector<8x128xf32>
    %103 = arith.addf %102, %96 : vector<8x128xf32>
    %104 = arith.truncf %103 : vector<8x128xf32> to vector<8x128xbf16>
    %c256 = arith.constant 256 : index
    %c0_43 = arith.constant 0 : index
    %105 = vector.load %arg4[%c256, %c0_43] : memref<896x128xbf16, #tpu.memory_space<vmem>>, vector<128x128xbf16>
    %cst_44 = arith.constant dense<0.000000e+00> : vector<8x128xf32>
    %106 = tpu.matmul %104, %105, %cst_44 {dimension_numbers = #tpu.dot_dimension_numbers<[1], [0], [0], [1], [0, 0, 1, 1], [], []>} : vector<8x128xbf16>, vector<128x128xbf16>, vector<8x128xf32> -> vector<8x128xf32>
    %c7 = arith.constant 7 : index
    %c0_45 = arith.constant 0 : index
    %107 = vector.load %arg5[%c7, %c0_45] : memref<16x512xf32, #tpu.memory_space<vmem>>, vector<1x128xf32>
    %c8 = arith.constant 8 : index
    %c0_46 = arith.constant 0 : index
    %108 = vector.load %arg5[%c8, %c0_46] : memref<16x512xf32, #tpu.memory_space<vmem>>, vector<1x128xf32>
    %cst_47 = arith.constant dense<0.000000e+00> : vector<128xf32>
    %109 = vector.multi_reduction <add>, %106, %cst_47 [0] : vector<8x128xf32> to vector<128xf32>
    %110 = vector.shape_cast %109 : vector<128xf32> to vector<1x128xf32>
    %111 = arith.mulf %106, %106 : vector<8x128xf32>
    %cst_48 = arith.constant dense<0.000000e+00> : vector<128xf32>
    %112 = vector.multi_reduction <add>, %111, %cst_48 [0] : vector<8x128xf32> to vector<128xf32>
    %113 = vector.shape_cast %112 : vector<128xf32> to vector<1x128xf32>
    %cst_49 = arith.constant 1.250000e-01 : f32
    %114 = vector.broadcast %cst_49 : f32 to vector<1x128xf32>
    %115 = arith.mulf %110, %114 : vector<1x128xf32>
    %cst_50 = arith.constant 1.250000e-01 : f32
    %116 = vector.broadcast %cst_50 : f32 to vector<1x128xf32>
    %117 = arith.mulf %113, %116 : vector<1x128xf32>
    %118 = arith.mulf %115, %115 : vector<1x128xf32>
    %119 = arith.subf %117, %118 : vector<1x128xf32>
    %cst_51 = arith.constant 0.000000e+00 : f32
    %120 = vector.broadcast %cst_51 : f32 to vector<1x128xf32>
    %121 = arith.maximumf %119, %120 : vector<1x128xf32>
    %cst_52 = arith.constant 9.99999974E-6 : f32
    %122 = vector.broadcast %cst_52 : f32 to vector<1x128xf32>
    %123 = arith.addf %121, %122 : vector<1x128xf32>
    %124 = math.rsqrt %123 : vector<1x128xf32>
    %125 = arith.mulf %107, %124 : vector<1x128xf32>
    %126 = arith.mulf %115, %125 : vector<1x128xf32>
    %127 = arith.subf %108, %126 : vector<1x128xf32>
    %128 = vector.broadcast %125 : vector<1x128xf32> to vector<8x128xf32>
    %129 = arith.mulf %106, %128 : vector<8x128xf32>
    %130 = vector.broadcast %127 : vector<1x128xf32> to vector<8x128xf32>
    %131 = arith.addf %129, %130 : vector<8x128xf32>
    %cst_53 = arith.constant 0.000000e+00 : f32
    %132 = vector.broadcast %cst_53 : f32 to vector<8x128xf32>
    %133 = arith.maximumf %131, %132 : vector<8x128xf32>
    %134 = arith.truncf %133 : vector<8x128xf32> to vector<8x128xbf16>
    %c512 = arith.constant 512 : index
    %c0_54 = arith.constant 0 : index
    %135 = vector.load %arg3[%c512, %c0_54] : memref<768x256xbf16, #tpu.memory_space<vmem>>, vector<128x256xbf16>
    %cst_55 = arith.constant dense<0.000000e+00> : vector<8x256xf32>
    %136 = tpu.matmul %134, %135, %cst_55 {dimension_numbers = #tpu.dot_dimension_numbers<[1], [0], [0], [1], [0, 0, 1, 1], [], []>} : vector<8x128xbf16>, vector<128x256xbf16>, vector<8x256xf32> -> vector<8x256xf32>
    %c9 = arith.constant 9 : index
    %c0_56 = arith.constant 0 : index
    %137 = vector.load %arg5[%c9, %c0_56] : memref<16x512xf32, #tpu.memory_space<vmem>>, vector<1x256xf32>
    %c10 = arith.constant 10 : index
    %c0_57 = arith.constant 0 : index
    %138 = vector.load %arg5[%c10, %c0_57] : memref<16x512xf32, #tpu.memory_space<vmem>>, vector<1x256xf32>
    %cst_58 = arith.constant dense<0.000000e+00> : vector<256xf32>
    %139 = vector.multi_reduction <add>, %136, %cst_58 [0] : vector<8x256xf32> to vector<256xf32>
    %140 = vector.shape_cast %139 : vector<256xf32> to vector<1x256xf32>
    %141 = arith.mulf %136, %136 : vector<8x256xf32>
    %cst_59 = arith.constant dense<0.000000e+00> : vector<256xf32>
    %142 = vector.multi_reduction <add>, %141, %cst_59 [0] : vector<8x256xf32> to vector<256xf32>
    %143 = vector.shape_cast %142 : vector<256xf32> to vector<1x256xf32>
    %cst_60 = arith.constant 1.250000e-01 : f32
    %144 = vector.broadcast %cst_60 : f32 to vector<1x256xf32>
    %145 = arith.mulf %140, %144 : vector<1x256xf32>
    %cst_61 = arith.constant 1.250000e-01 : f32
    %146 = vector.broadcast %cst_61 : f32 to vector<1x256xf32>
    %147 = arith.mulf %143, %146 : vector<1x256xf32>
    %148 = arith.mulf %145, %145 : vector<1x256xf32>
    %149 = arith.subf %147, %148 : vector<1x256xf32>
    %cst_62 = arith.constant 0.000000e+00 : f32
    %150 = vector.broadcast %cst_62 : f32 to vector<1x256xf32>
    %151 = arith.maximumf %149, %150 : vector<1x256xf32>
    %cst_63 = arith.constant 9.99999974E-6 : f32
    %152 = vector.broadcast %cst_63 : f32 to vector<1x256xf32>
    %153 = arith.addf %151, %152 : vector<1x256xf32>
    %154 = math.rsqrt %153 : vector<1x256xf32>
    %155 = arith.mulf %137, %154 : vector<1x256xf32>
    %156 = arith.mulf %145, %155 : vector<1x256xf32>
    %157 = arith.subf %138, %156 : vector<1x256xf32>
    %158 = vector.broadcast %155 : vector<1x256xf32> to vector<8x256xf32>
    %159 = arith.mulf %136, %158 : vector<8x256xf32>
    %160 = vector.broadcast %157 : vector<1x256xf32> to vector<8x256xf32>
    %161 = arith.addf %159, %160 : vector<8x256xf32>
    %cst_64 = arith.constant 0.000000e+00 : f32
    %162 = vector.broadcast %cst_64 : f32 to vector<8x256xf32>
    %163 = arith.maximumf %161, %162 : vector<8x256xf32>
    %164 = arith.truncf %163 : vector<8x256xf32> to vector<8x256xbf16>
    %c128 = arith.constant 128 : index
    %c0_65 = arith.constant 0 : index
    %165 = vector.load %arg2[%c128, %c0_65] : memref<384x512xbf16, #tpu.memory_space<vmem>>, vector<256x512xbf16>
    %cst_66 = arith.constant dense<0.000000e+00> : vector<8x512xf32>
    %166 = tpu.matmul %164, %165, %cst_66 {dimension_numbers = #tpu.dot_dimension_numbers<[1], [0], [0], [1], [0, 0, 1, 1], [], []>} : vector<8x256xbf16>, vector<256x512xbf16>, vector<8x512xf32> -> vector<8x512xf32>
    %c11 = arith.constant 11 : index
    %c0_67 = arith.constant 0 : index
    %167 = vector.load %arg5[%c11, %c0_67] : memref<16x512xf32, #tpu.memory_space<vmem>>, vector<1x512xf32>
    %c12 = arith.constant 12 : index
    %c0_68 = arith.constant 0 : index
    %168 = vector.load %arg5[%c12, %c0_68] : memref<16x512xf32, #tpu.memory_space<vmem>>, vector<1x512xf32>
    %cst_69 = arith.constant dense<0.000000e+00> : vector<512xf32>
    %169 = vector.multi_reduction <add>, %166, %cst_69 [0] : vector<8x512xf32> to vector<512xf32>
    %170 = vector.shape_cast %169 : vector<512xf32> to vector<1x512xf32>
    %171 = arith.mulf %166, %166 : vector<8x512xf32>
    %cst_70 = arith.constant dense<0.000000e+00> : vector<512xf32>
    %172 = vector.multi_reduction <add>, %171, %cst_70 [0] : vector<8x512xf32> to vector<512xf32>
    %173 = vector.shape_cast %172 : vector<512xf32> to vector<1x512xf32>
    %cst_71 = arith.constant 1.250000e-01 : f32
    %174 = vector.broadcast %cst_71 : f32 to vector<1x512xf32>
    %175 = arith.mulf %170, %174 : vector<1x512xf32>
    %cst_72 = arith.constant 1.250000e-01 : f32
    %176 = vector.broadcast %cst_72 : f32 to vector<1x512xf32>
    %177 = arith.mulf %173, %176 : vector<1x512xf32>
    %178 = arith.mulf %175, %175 : vector<1x512xf32>
    %179 = arith.subf %177, %178 : vector<1x512xf32>
    %cst_73 = arith.constant 0.000000e+00 : f32
    %180 = vector.broadcast %cst_73 : f32 to vector<1x512xf32>
    %181 = arith.maximumf %179, %180 : vector<1x512xf32>
    %cst_74 = arith.constant 9.99999974E-6 : f32
    %182 = vector.broadcast %cst_74 : f32 to vector<1x512xf32>
    %183 = arith.addf %181, %182 : vector<1x512xf32>
    %184 = math.rsqrt %183 : vector<1x512xf32>
    %185 = arith.mulf %167, %184 : vector<1x512xf32>
    %186 = arith.mulf %175, %185 : vector<1x512xf32>
    %187 = arith.subf %168, %186 : vector<1x512xf32>
    %188 = vector.broadcast %185 : vector<1x512xf32> to vector<8x512xf32>
    %189 = arith.mulf %166, %188 : vector<8x512xf32>
    %190 = vector.broadcast %187 : vector<1x512xf32> to vector<8x512xf32>
    %191 = arith.addf %189, %190 : vector<8x512xf32>
    %cst_75 = arith.constant 0.000000e+00 : f32
    %192 = vector.broadcast %cst_75 : f32 to vector<8x512xf32>
    %193 = arith.maximumf %191, %192 : vector<8x512xf32>
    %194 = arith.truncf %193 : vector<8x512xf32> to vector<8x512xbf16>
    %c384 = arith.constant 384 : index
    %c0_76 = arith.constant 0 : index
    %195 = vector.load %arg4[%c384, %c0_76] : memref<896x128xbf16, #tpu.memory_space<vmem>>, vector<512x128xbf16>
    %cst_77 = arith.constant dense<0.000000e+00> : vector<8x128xf32>
    %196 = tpu.matmul %194, %195, %cst_77 {dimension_numbers = #tpu.dot_dimension_numbers<[1], [0], [0], [1], [0, 0, 1, 1], [], []>} : vector<8x512xbf16>, vector<512x128xbf16>, vector<8x128xf32> -> vector<8x128xf32>
    %c13 = arith.constant 13 : index
    %c0_78 = arith.constant 0 : index
    %197 = vector.load %arg5[%c13, %c0_78] : memref<16x512xf32, #tpu.memory_space<vmem>>, vector<1x128xf32>
    %198 = vector.broadcast %197 : vector<1x128xf32> to vector<8x128xf32>
    %199 = arith.addf %196, %198 : vector<8x128xf32>
    %200 = arith.negf %199 : vector<8x128xf32>
    %201 = math.exp %200 : vector<8x128xf32>
    %cst_79 = arith.constant 1.000000e+00 : f32
    %202 = vector.broadcast %cst_79 : f32 to vector<8x128xf32>
    %203 = arith.addf %202, %201 : vector<8x128xf32>
    %204 = arith.divf %202, %203 : vector<8x128xf32>
    %c0_80 = arith.constant 0 : index
    %c0_81 = arith.constant 0 : index
    %205 = vector.load %arg6[%c0_80, %c0_81] : memref<8x256xf32, #tpu.memory_space<vmem>>, vector<8x128xf32>
    tpu.vector_store %arg6[%c0_80, %c0_81], %204 {strides = array<i32>} : memref<8x256xf32, #tpu.memory_space<vmem>>, vector<8x128xf32>,
    %c0_82 = arith.constant 0 : index
    %c128_83 = arith.constant 128 : index
    %206 = vector.load %arg6[%c0_82, %c128_83] : memref<8x256xf32, #tpu.memory_space<vmem>>, vector<8x128xf32>
    tpu.vector_store %arg6[%c0_82, %c128_83], %103 {strides = array<i32>} : memref<8x256xf32, #tpu.memory_space<vmem>>, vector<8x128xf32>,
    return
  }
}

</mosaic_0001>

<bundles_post_ra>
// kernel: vaefc_forward.1
= control target key start
LH: loop header
LB: loop body
LE: loop exit
PB: predicated region body
PF: predicated region fallthrough
CT: control target
= control target key end

     0   :  { %11 = vsyncpa [#allocation3], 0  ;;  %s3967_s0 = inlined_call_operand.vmem [shape: bf16[8,128], index: 0, kind: input, shape index: {}]   ;;  %s3968_s1 = inlined_call_operand.vmem [shape: f32[8,128], index: 1, kind: input, shape index: {}]   ;;  %s3969_s2 = inlined_call_operand.hbm [shape: bf16[384,512], index: 2, kind: input, shape index: {}]   ;;  %s3970_s3 = inlined_call_operand.hbm [shape: bf16[768,256], index: 3, kind: input, shape index: {}]   ;;  %s3971_s4 = inlined_call_operand.hbm [shape: bf16[896,128], index: 4, kind: input, shape index: {}]   ;;  %s3972_s5 = inlined_call_operand.hbm [shape: f32[16,512], index: 5, kind: input, shape index: {}]   ;;  %s3973_s6 = inlined_call_operand.vmem [shape: f32[8,256], index: 6, kind: output, shape index: {}]  }
   0x1   :  { %12 = vsyncpa [#allocation5], 0 }
   0x2   :  { %13 = vsyncpa [#allocation8], 0  ;;  %s3737_s21 = smov [#allocation4]   ;;  %s3643_s25 = scalar_lea.hbm %s3970_s3, 12288 }
   0x3   :  { %s35_s22 = sshll.u32 %s3737_s21, 4  ;;  %p3644_p0 = scmp.ne.s32.totalorder %s3970_s3, %s3643_s25  ;;  %s36_s22 = int_to_ptr.vmem [resolvable:$true] %s35_s22 }
   0x4   :  { %p3647_p1 = scmp.lt.u32.totalorder %s3643_s25, %s3970_s3 }
   0x6   :  { %p3649_p2 = pnand %p3647_p1, %p3644_p0 }
   0x8   :  { %3652 = shalt.err (!%p3649_p2)
}
   0x9   :  { %s3653_s30 = scalar_lea.vmem %s36_s22, 12288  ;;  %p3658_p4 = scmp.lt.s32.totalorder %s36_s22, %s36_s22 }
   0xa   :  { %p3654_p3 = scmp.ne.s32.totalorder %s36_s22, %s3653_s30  ;;  %p3659_p5 = scmp.lt.s32.totalorder %s3653_s30, %s3653_s30 }
   0xc   :  { %p3660_p6 = por %p3659_p5, %p3658_p4 }
   0xe   :  { %p3661_p7 = pnand %p3660_p6, %p3654_p3 }
  0x10   :  { %3664 = shalt.err (!%p3661_p7)
}
  0x11   :  { %s3738_s7 = smov 128   ;;  %s3739_s8 = smov 8  }
  0x12   :  { %41 = dma.hbm_to_vmem [thread:$0]  %s3970_s3, 12288, %s36_s22, [#allocation5], %s3738_s7, %s3738_s7, %s3739_s8  }
  0x13   :  { %s3740_s11 = smov [#allocation2]   ;;  %s3665_s15 = scalar_lea.hbm %s3969_s2, 12288 }
  0x14   :  { %s23_s12 = sshll.u32 %s3740_s11, 4  ;;  %p3666_p8 = scmp.ne.s32.totalorder %s3969_s2, %s3665_s15  ;;  %s24_s12 = int_to_ptr.vmem [resolvable:$true] %s23_s12 }
  0x15   :  { %p3669_p9 = scmp.lt.u32.totalorder %s3665_s15, %s3969_s2 }
  0x17   :  { %p3671_p10 = pnand %p3669_p9, %p3666_p8 }
  0x19   :  { %3674 = shalt.err (!%p3671_p10)
}
  0x1a   :  { %s3675_s20 = scalar_lea.vmem %s24_s12, 12288  ;;  %p3680_p12 = scmp.lt.s32.totalorder %s24_s12, %s24_s12 }
  0x1b   :  { %p3676_p11 = scmp.ne.s32.totalorder %s24_s12, %s3675_s20  ;;  %p3681_p13 = scmp.lt.s32.totalorder %s3675_s20, %s3675_s20 }
  0x1d   :  { %p3682_p0 = por %p3681_p13, %p3680_p12 }
  0x1f   :  { %p3683_p1 = pnand %p3682_p0, %p3676_p11 }
  0x21   :  { %3686 = shalt.err (!%p3683_p1)
}
  0x22   :  { %s3741_s3 = smov 256   ;;  %s3742_s21 = smov 16  }
  0x23   :  { %29 = dma.hbm_to_vmem [thread:$0]  %s3969_s2, 12288, %s24_s12, [#allocation3], %s3741_s3, %s3741_s3, %s3742_s21  }
  0x24   :  { %s3743_s24 = smov [#allocation6]   ;;  %s3687_s28 = scalar_lea.hbm %s3971_s4, 7168 }
  0x25   :  { %s47_s25 = sshll.u32 %s3743_s24, 4  ;;  %p3688_p2 = scmp.ne.s32.totalorder %s3971_s4, %s3687_s28  ;;  %s48_s25 = int_to_ptr.vmem [resolvable:$true] %s47_s25 }
  0x26   :  { %p3691_p3 = scmp.lt.u32.totalorder %s3687_s28, %s3971_s4 }
  0x28   :  { %p3693_p4 = pnand %p3691_p3, %p3688_p2 }
  0x2a   :  { %3696 = shalt.err (!%p3693_p4)
}
  0x2b   :  { %s3697_s9 = scalar_lea.vmem %s48_s25, 7168  ;;  %p3702_p6 = scmp.lt.s32.totalorder %s48_s25, %s48_s25 }
  0x2c   :  { %p3698_p5 = scmp.ne.s32.totalorder %s48_s25, %s3697_s9  ;;  %p3703_p7 = scmp.lt.s32.totalorder %s3697_s9, %s3697_s9 }
  0x2e   :  { %p3704_p8 = por %p3703_p7, %p3702_p6 }
  0x30   :  { %p3705_p9 = pnand %p3704_p8, %p3698_p5 }
  0x32   :  { %3708 = shalt.err (!%p3705_p9)
}
  0x33   :  { %s3744_s2 = smov 64   ;;  %s3745_s10 = smov 4  }
  0x34   :  { %53 = dma.hbm_to_vmem [thread:$0]  %s3971_s4, 7168, %s48_s25, [#allocation5], %s3744_s2, %s3744_s2, %s3745_s10  }
  0x35   :  { %s3746_s13 = smov [#allocation7]   ;;  %s3709_s17 = scalar_lea.hbm %s3972_s5, 1024 }
  0x36   :  { %s59_s14 = sshll.u32 %s3746_s13, 4  ;;  %p3710_p10 = scmp.ne.s32.totalorder %s3972_s5, %s3709_s17  ;;  %s60_s14 = int_to_ptr.vmem [resolvable:$true] %s59_s14 }
  0x37   :  { %p3713_p11 = scmp.lt.u32.totalorder %s3709_s17, %s3972_s5 }
  0x39   :  { %p3715_p12 = pnand %p3713_p11, %p3710_p10 }
  0x3b   :  { %3718 = shalt.err (!%p3715_p12)
}
  0x3c   :  { %s3719_s21 = scalar_lea.vmem %s60_s14, 1024  ;;  %p3724_p0 = scmp.lt.s32.totalorder %s60_s14, %s60_s14 }
  0x3d   :  { %p3720_p13 = scmp.ne.s32.totalorder %s60_s14, %s3719_s21  ;;  %p3725_p1 = scmp.lt.s32.totalorder %s3719_s21, %s3719_s21 }
  0x3f   :  { %p3726_p2 = por %p3725_p1, %p3724_p0 }
  0x41   :  { %p3727_p3 = pnand %p3726_p2, %p3720_p13 }
  0x43   :  { %3730 = shalt.err (!%p3727_p3)
}
  0x44   :  { %s3747_s4 = smov 512   ;;  %s3748_s22 = smov 32  }
  0x45   :  { %65 = dma.hbm_to_vmem [thread:$0]  %s3972_s5, 1024, %s60_s14, [#allocation8], %s3747_s4, %s3747_s4, %s3748_s22  }
  0x46   :  { %3731 = dma.done.wait [#allocation3], 12288  }
  0x47   :  { %3732 = vsyncadd [#allocation3], 4294955008 }
  0x48   :  { %3733 = dma.done.wait [#allocation5], 19456  }
  0x49   :  { %3734 = vsyncadd [#allocation5], 4294947840 }
  0x4a   :  { %3735 = dma.done.wait [#allocation8], 1024  }
  0x4b   :  { %3736 = vsyncadd [#allocation8], 4294966272  ;;  %v3749_v0 = vmov 0   ;;  %v3265_v1 = vld [vmem:[#allocation2 + $0x4] ss:$16 sps:$4 sm:$0xff]   ;;  %vm3752_vm0 = vmmov 0  }
  0x4c   :  { %304 = vmatprep.mubr.bf16.mxu0 %v3749_v0  ;;  %345 = vmatprep.mubr.bf16.mxu1 %v3749_v0  ;;  %v3267_v2 = vld [vmem:[#allocation2 + $0xc] ss:$16 sps:$4 sm:$0xff]   ;;  %v3269_v3 = vld [vmem:[#allocation2] ss:$16 sps:$4 sm:$0xff]   ;;  %v3270_v4 = vld [vmem:[#allocation2 + $0x8] ss:$16 sps:$4 sm:$0xff]  }
  0x4d   :  { %272 = vmatprep.subr.bf16.mxu0 %v3265_v1  ;;  %313 = vmatprep.subr.bf16.mxu1 %v3267_v2  ;;  %v3271_v5 = vld [vmem:[#allocation2 + $0x24] ss:$16 sps:$4 sm:$0xff]   ;;  %v3273_v6 = vld [vmem:[#allocation2 + $0x2c] ss:$16 sps:$4 sm:$0xff]   ;;  %v3275_v7 = vld [vmem:[#allocation2 + $0x20] ss:$16 sps:$4 sm:$0xff]  }
  0x4e   :  { %273 = vmatpush1.bf16.msra.mxu0 %v3269_v3  ;;  %314 = vmatpush1.bf16.msra.mxu1 %v3270_v4  ;;  %v3276_v8 = vld [vmem:[#allocation2 + $0x28] ss:$16 sps:$4 sm:$0xff]   ;;  %v3277_v9 = vld [vmem:[#allocation2 + $0x44] ss:$16 sps:$4 sm:$0xff]   ;;  %v3279_v10 = vld [vmem:[#allocation2 + $0x4c] ss:$16 sps:$4 sm:$0xff]  }
  0x4f   :  { %274 = vmatprep.subr.bf16.mxu0 %v3271_v5  ;;  %315 = vmatprep.subr.bf16.mxu1 %v3273_v6  ;;  %v3281_v11 = vld [vmem:[#allocation2 + $0x40] ss:$16 sps:$4 sm:$0xff]   ;;  %v3282_v12 = vld [vmem:[#allocation2 + $0x48] ss:$16 sps:$4 sm:$0xff]   ;;  %v3283_v13 = vld [vmem:[#allocation2 + $0x64] ss:$16 sps:$4 sm:$0xff]  }
  0x50   :  { %v3285_v14 = vld [vmem:[#allocation2 + $0x6c] ss:$16 sps:$4 sm:$0xff]   ;;  %v3287_v15 = vld [vmem:[#allocation2 + $0x60] ss:$16 sps:$4 sm:$0xff]   ;;  %v3288_v16 = vld [vmem:[#allocation2 + $0x68] ss:$16 sps:$4 sm:$0xff]  }
  0x51   :  { %v3289_v17 = vld [vmem:[#allocation2 + $0x84] ss:$16 sps:$4 sm:$0xff]   ;;  %v3291_v18 = vld [vmem:[#allocation2 + $0x8c] ss:$16 sps:$4 sm:$0xff]   ;;  %v3293_v19 = vld [vmem:[#allocation2 + $0x80] ss:$16 sps:$4 sm:$0xff]  }
  0x52   :  { %275 = vmatpush1.bf16.msra.mxu0 %v3275_v7  ;;  %316 = vmatpush1.bf16.msra.mxu1 %v3276_v8  ;;  %v3294_v20 = vld [vmem:[#allocation2 + $0x88] ss:$16 sps:$4 sm:$0xff]   ;;  %v3295_v21 = vld [vmem:[#allocation2 + $0xa4] ss:$16 sps:$4 sm:$0xff]   ;;  %v3297_v22 = vld [vmem:[#allocation2 + $0xac] ss:$16 sps:$4 sm:$0xff]  }
  0x53   :  { %276 = vmatprep.subr.bf16.mxu0 %v3277_v9  ;;  %317 = vmatprep.subr.bf16.mxu1 %v3279_v10  ;;  %v3299_v23 = vld [vmem:[#allocation2 + $0xa0] ss:$16 sps:$4 sm:$0xff]   ;;  %v3300_v24 = vld [vmem:[#allocation2 + $0xa8] ss:$16 sps:$4 sm:$0xff]   ;;  %v3301_v25 = vld [vmem:[#allocation2 + $0xc4] ss:$16 sps:$4 sm:$0xff]  }
  0x54   :  { %v3303_v26 = vld [vmem:[#allocation2 + $0xcc] ss:$16 sps:$4 sm:$0xff]   ;;  %v3305_v27 = vld [vmem:[#allocation2 + $0xc0] ss:$16 sps:$4 sm:$0xff]   ;;  %v3306_v28 = vld [vmem:[#allocation2 + $0xc8] ss:$16 sps:$4 sm:$0xff]  }
  0x55   :  { %v3307_v29 = vld [vmem:[#allocation2 + $0xe4] ss:$16 sps:$4 sm:$0xff]   ;;  %v3309_v30 = vld [vmem:[#allocation2 + $0xec] ss:$16 sps:$4 sm:$0xff]   ;;  %v3311_v31 = vld [vmem:[#allocation2 + $0xe0] ss:$16 sps:$4 sm:$0xff]  }
  0x56   :  { %277 = vmatpush1.bf16.msra.mxu0 %v3281_v11  ;;  %318 = vmatpush1.bf16.msra.mxu1 %v3282_v12  ;;  %v3312_v32 = vld [vmem:[#allocation2 + $0xe8] ss:$16 sps:$4 sm:$0xff]   ;;  %v79_v33 = vld [vmem:[%s3967_s0] sm:$0xf]  ;;  %v3315_v34 = vld [vmem:[#allocation4 + $0x4] ss:$8 sps:$4 sm:$0xff]  }
  0x57   :  { %278 = vmatprep.subr.bf16.mxu0 %v3283_v13  ;;  %319 = vmatprep.subr.bf16.mxu1 %v3285_v14  ;;  %v3313_v35 = vld [vmem:[#allocation4] ss:$8 sps:$4 sm:$0xff]   ;;  %v3318_v36 = vld [vmem:[#allocation4 + $0x14] ss:$8 sps:$4 sm:$0xff]   ;;  %v3316_v37 = vld [vmem:[#allocation4 + $0x10] ss:$8 sps:$4 sm:$0xff]  }
  0x58   :  { %v3321_v38 = vld [vmem:[#allocation4 + $0x24] ss:$8 sps:$4 sm:$0xff]   ;;  %v3319_v39 = vld [vmem:[#allocation4 + $0x20] ss:$8 sps:$4 sm:$0xff]   ;;  %v3324_v40 = vld [vmem:[#allocation4 + $0x34] ss:$8 sps:$4 sm:$0xff]  }
  0x59   :  { %v3322_v41 = vld [vmem:[#allocation4 + $0x30] ss:$8 sps:$4 sm:$0xff]   ;;  %v3327_v42 = vld [vmem:[#allocation4 + $0x44] ss:$8 sps:$4 sm:$0xff]   ;;  %v3325_v43 = vld [vmem:[#allocation4 + $0x40] ss:$8 sps:$4 sm:$0xff]  }
  0x5a   :  { %279 = vmatpush1.bf16.msra.mxu0 %v3287_v15  ;;  %320 = vmatpush1.bf16.msra.mxu1 %v3288_v16  ;;  %v3330_v44 = vld [vmem:[#allocation4 + $0x54] ss:$8 sps:$4 sm:$0xff]   ;;  %v3328_v45 = vld [vmem:[#allocation4 + $0x50] ss:$8 sps:$4 sm:$0xff]   ;;  %v3333_v46 = vld [vmem:[#allocation4 + $0x64] ss:$8 sps:$4 sm:$0xff]  }
  0x5b   :  { %280 = vmatprep.subr.bf16.mxu0 %v3289_v17  ;;  %321 = vmatprep.subr.bf16.mxu1 %v3291_v18  ;;  %v3331_v47 = vld [vmem:[#allocation4 + $0x60] ss:$8 sps:$4 sm:$0xff]   ;;  %v3336_v48 = vld [vmem:[#allocation4 + $0x74] ss:$8 sps:$4 sm:$0xff]   ;;  %v3334_v49 = vld [vmem:[#allocation4 + $0x70] ss:$8 sps:$4 sm:$0xff]  }
  0x5c   :  { %v3339_v50 = vld [vmem:[#allocation4 + $0x84] ss:$8 sps:$4 sm:$0xff]   ;;  %v3337_v51 = vld [vmem:[#allocation4 + $0x80] ss:$8 sps:$4 sm:$0xff]   ;;  %v3342_v52 = vld [vmem:[#allocation4 + $0x94] ss:$8 sps:$4 sm:$0xff]  }
  0x5d   :  { %v3340_v53 = vld [vmem:[#allocation4 + $0x90] ss:$8 sps:$4 sm:$0xff]   ;;  %v3345_v54 = vld [vmem:[#allocation4 + $0xa4] ss:$8 sps:$4 sm:$0xff]   ;;  %v3343_v55 = vld [vmem:[#allocation4 + $0xa0] ss:$8 sps:$4 sm:$0xff]  }
  0x5e   :  { %281 = vmatpush1.bf16.msra.mxu0 %v3293_v19  ;;  %322 = vmatpush1.bf16.msra.mxu1 %v3294_v20  ;;  %v3348_v56 = vld [vmem:[#allocation4 + $0xb4] ss:$8 sps:$4 sm:$0xff]   ;;  %v3346_v57 = vld [vmem:[#allocation4 + $0xb0] ss:$8 sps:$4 sm:$0xff]   ;;  %v3351_v58 = vld [vmem:[#allocation4 + $0xc4] ss:$8 sps:$4 sm:$0xff]  }
  0x5f   :  { %282 = vmatprep.subr.bf16.mxu0 %v3295_v21  ;;  %323 = vmatprep.subr.bf16.mxu1 %v3297_v22  ;;  %v3349_v59 = vld [vmem:[#allocation4 + $0xc0] ss:$8 sps:$4 sm:$0xff]   ;;  %v3354_v60 = vld [vmem:[#allocation4 + $0xd4] ss:$8 sps:$4 sm:$0xff]   ;;  %v3352_v61 = vld [vmem:[#allocation4 + $0xd0] ss:$8 sps:$4 sm:$0xff]  }
  0x60   :  { %v3357_v62 = vld [vmem:[#allocation4 + $0xe4] ss:$8 sps:$4 sm:$0xff]   ;;  %v3355_v63 = vld [vmem:[#allocation4 + $0xe0] ss:$8 sps:$4 sm:$0xff]   ;;  %v3360_v1 = vld [vmem:[#allocation4 + $0xf4] ss:$8 sps:$4 sm:$0xff]  }
  0x61   :  { %v3358_v2 = vld [vmem:[#allocation4 + $0xf0] ss:$8 sps:$4 sm:$0xff]   ;;  %v3363_v3 = vld [vmem:[#allocation4 + $0x104] ss:$8 sps:$4 sm:$0xff]  }
  0x62   :  { %283 = vmatpush1.bf16.msra.mxu0 %v3299_v23  ;;  %324 = vmatpush1.bf16.msra.mxu1 %v3300_v24 }
  0x63   :  { %284 = vmatprep.subr.bf16.mxu0 %v3301_v25  ;;  %325 = vmatprep.subr.bf16.mxu1 %v3303_v26 }
  0x66   :  { %285 = vmatpush1.bf16.msra.mxu0 %v3305_v27  ;;  %326 = vmatpush1.bf16.msra.mxu1 %v3306_v28 }
  0x67   :  { %286 = vmatprep.subr.bf16.mxu0 %v3307_v29  ;;  %327 = vmatprep.subr.bf16.mxu1 %v3309_v30 }
  0x6a   :  { %287 = vmatpush1.bf16.msra.mxu0 %v3311_v31  ;;  %328 = vmatpush1.bf16.msra.mxu1 %v3312_v32 }
  0x6b   :  { %943 = vmatprep.subr.bf16.mxu0 %v3315_v34 }
  0x6d   :  { %305 = vmatmul.mubr.bf16.vlgmr.msra.gmra.mrb[0].mxu0 %v79_v33  ;;  %346 = vmatmul.mubr.bf16.vlgmr.msra.gmra.mrb[0].mxu1 %v79_v33 }
  0x6e   :  { %944 = vmatpush1.bf16.msra.mxu0 %v3313_v35 }
  0x6f   :  { %945 = vmatprep.subr.bf16.mxu0 %v3318_v36 }
  0x72   :  { %946 = vmatpush1.bf16.msra.mxu0 %v3316_v37 }
  0x73   :  { %947 = vmatprep.subr.bf16.mxu0 %v3321_v38 }
  0x76   :  { %948 = vmatpush1.bf16.msra.mxu0 %v3319_v39 }
  0x77   :  { %949 = vmatprep.subr.bf16.mxu0 %v3324_v40 }
  0x7a   :  { %950 = vmatpush1.bf16.msra.mxu0 %v3322_v41 }
  0x7b   :  { %951 = vmatprep.subr.bf16.mxu0 %v3327_v42 }
  0x7e   :  { %952 = vmatpush1.bf16.msra.mxu0 %v3325_v43 }
  0x7f   :  { %953 = vmatprep.subr.bf16.mxu0 %v3330_v44 }
  0x82   :  { %954 = vmatpush1.bf16.msra.mxu0 %v3328_v45 }
  0x83   :  { %955 = vmatprep.subr.bf16.mxu0 %v3333_v46 }
  0x86   :  { %956 = vmatpush1.bf16.msra.mxu0 %v3331_v47 }
  0x87   :  { %957 = vmatprep.subr.bf16.mxu0 %v3336_v48 }
  0x8a   :  { %958 = vmatpush1.bf16.msra.mxu0 %v3334_v49 }
  0x8b   :  { %959 = vmatprep.subr.bf16.mxu0 %v3339_v50 }
  0x8e   :  { %960 = vmatpush1.bf16.msra.mxu0 %v3337_v51 }
  0x8f   :  { %961 = vmatprep.subr.bf16.mxu0 %v3342_v52 }
  0x92   :  { %962 = vmatpush1.bf16.msra.mxu0 %v3340_v53 }
  0x93   :  { %963 = vmatprep.subr.bf16.mxu0 %v3345_v54 }
  0x96   :  { %964 = vmatpush1.bf16.msra.mxu0 %v3343_v55 }
  0x97   :  { %965 = vmatprep.subr.bf16.mxu0 %v3348_v56 }
  0x9a   :  { %966 = vmatpush1.bf16.msra.mxu0 %v3346_v57 }
  0x9b   :  { %967 = vmatprep.subr.bf16.mxu0 %v3351_v58 }
  0x9e   :  { %968 = vmatpush1.bf16.msra.mxu0 %v3349_v59 }
  0x9f   :  { %969 = vmatprep.subr.bf16.mxu0 %v3354_v60 }
  0xa2   :  { %970 = vmatpush1.bf16.msra.mxu0 %v3352_v61 }
  0xa3   :  { %971 = vmatprep.subr.bf16.mxu0 %v3357_v62 }
  0xa6   :  { %972 = vmatpush1.bf16.msra.mxu0 %v3355_v63 }
  0xa7   :  { %973 = vmatprep.subr.bf16.mxu0 %v3360_v1 }
  0xaa   :  { %974 = vmatpush1.bf16.msra.mxu0 %v3358_v2 }
  0xab   :  { %984 = vmatprep.subr.bf16.mxu0 %v3363_v3 }
 0x140   :  { %v3841_v4 = vpop.f32.mrb[0].mxu0  ;;  %v3843_v5 = vpop.f32.mrb[0].mxu1 }
 0x141   :  { %v357_v6 = vrot.slane %v3841_v4, 4  ;;  %v381_v7 = vmul.f32 %v3841_v4, %v3841_v4  ;;  %v369_v8 = vrot.slane %v3843_v5, 4  ;;  %v383_v9 = vmul.f32 %v3843_v5, %v3843_v5  ;;  %v3851_v10 = vpop.f32.mrb[1].mxu0  ;;  %v3853_v11 = vpop.f32.mrb[1].mxu1 }
 0x142   :  { %v363_v12 = vrot.slane %v3851_v10, 4  ;;  %v382_v13 = vmul.f32 %v3851_v10, %v3851_v10  ;;  %v375_v14 = vrot.slane %v3853_v11, 4  ;;  %v384_v15 = vmul.f32 %v3853_v11, %v3853_v11  ;;  %v310_v16 = vpop.f32.mrb[2].mxu0  ;;  %v351_v17 = vpop.f32.mrb[2].mxu1 }
 0x143   :  { %v358_v18 = vadd.f32 %v357_v6, %v3841_v4  ;;  %v385_v19 = vrot.slane %v381_v7, 4  ;;  %v370_v20 = vadd.f32 %v369_v8, %v3843_v5  ;;  %v397_v21 = vrot.slane %v383_v9, 4  ;;  %v311_v22 = vpop.f32.mrb[3].mxu0  ;;  %v352_v23 = vpop.f32.mrb[3].mxu1 }
 0x144   :  { %v364_v24 = vadd.f32 %v363_v12, %v3851_v10  ;;  %v391_v25 = vrot.slane %v382_v13, 4  ;;  %v376_v26 = vadd.f32 %v375_v14, %v3853_v11  ;;  %v403_v27 = vrot.slane %v384_v15, 4 }
 0x145   :  { %v359_v28 = vrot.slane %v358_v18, 2  ;;  %v386_v29 = vadd.f32 %v385_v19, %v381_v7  ;;  %v371_v30 = vrot.slane %v370_v20, 2  ;;  %v398_v31 = vadd.f32 %v397_v21, %v383_v9 }
 0x146   :  { %v365_v32 = vrot.slane %v364_v24, 2  ;;  %v392_v33 = vadd.f32 %v391_v25, %v382_v13  ;;  %v377_v34 = vrot.slane %v376_v26, 2  ;;  %v404_v35 = vadd.f32 %v403_v27, %v384_v15 }
 0x147   :  { %v360_v36 = vadd.f32 %v359_v28, %v358_v18  ;;  %v387_v37 = vrot.slane %v386_v29, 2  ;;  %v372_v38 = vadd.f32 %v371_v30, %v370_v20  ;;  %v399_v39 = vrot.slane %v398_v31, 2 }
 0x148   :  { %v366_v40 = vadd.f32 %v365_v32, %v364_v24  ;;  %v393_v41 = vrot.slane %v392_v33, 2  ;;  %v378_v42 = vadd.f32 %v377_v34, %v376_v26  ;;  %v405_v43 = vrot.slane %v404_v35, 2 }
 0x149   :  { %v361_v44 = vrot.slane %v360_v36, 1  ;;  %v388_v45 = vadd.f32 %v387_v37, %v386_v29  ;;  %v373_v46 = vrot.slane %v372_v38, 1  ;;  %v400_v47 = vadd.f32 %v399_v39, %v398_v31 }
 0x14a   :  { %v367_v48 = vrot.slane %v366_v40, 1  ;;  %v394_v49 = vadd.f32 %v393_v41, %v392_v33  ;;  %v379_v50 = vrot.slane %v378_v42, 1  ;;  %v406_v51 = vadd.f32 %v405_v43, %v404_v35 }
 0x14b   :  { %v362_v52 = vadd.f32 %v361_v44, %v360_v36  ;;  %v389_v53 = vrot.slane %v388_v45, 1  ;;  %v374_v54 = vadd.f32 %v373_v46, %v372_v38  ;;  %v401_v55 = vrot.slane %v400_v47, 1  ;;  %v354_v44 = vld [vmem:[#allocation7] ss:$8 sm:$0xf] }
 0x14c   :  { %v368_v56 = vadd.f32 %v367_v48, %v366_v40  ;;  %v395_v57 = vrot.slane %v394_v49, 1  ;;  %v380_v58 = vadd.f32 %v379_v50, %v378_v42  ;;  %v407_v59 = vrot.slane %v406_v51, 1 }
 0x14d   :  { %v390_v60 = vadd.f32 %v389_v53, %v388_v45  ;;  %v409_v61 = vmul.f32 0.125, %v362_v52  ;;  %v402_v62 = vadd.f32 %v401_v55, %v400_v47  ;;  %v411_v63 = vmul.f32 0.125, %v374_v54 }
 0x14e   :  { %v396_v1 = vadd.f32 %v395_v57, %v394_v49  ;;  %v410_v2 = vmul.f32 0.125, %v368_v56  ;;  %v408_v3 = vadd.f32 %v407_v59, %v406_v51  ;;  %v412_v6 = vmul.f32 0.125, %v380_v58 }
 0x14f   :  { %v413_v7 = vmul.f32 0.125, %v390_v60  ;;  %v417_v8 = vmul.f32 %v409_v61, %v409_v61  ;;  %v415_v9 = vmul.f32 0.125, %v402_v62  ;;  %v419_v12 = vmul.f32 %v411_v63, %v411_v63 }
 0x150   :  { %v414_v13 = vmul.f32 0.125, %v396_v1  ;;  %v418_v14 = vmul.f32 %v410_v2, %v410_v2  ;;  %v416_v15 = vmul.f32 0.125, %v408_v3  ;;  %v420_v16 = vmul.f32 %v412_v6, %v412_v6 }
 0x151   :  { %v421_v17 = vsub.f32 %v413_v7, %v417_v8  ;;  %v423_v18 = vsub.f32 %v415_v9, %v419_v12  ;;  %v3750_v29 = vmov 1966171168   ;;  %v446_v31 = vlaneseq }
 0x152   :  { %v422_v19 = vsub.f32 %v414_v13, %v418_v14  ;;  %v424_v20 = vsub.f32 %v416_v15, %v420_v16  ;;  %v444_v30 = vunpack.c.l.s4 %v3750_v29  ;;  %v356_v13 = vld [vmem:[#allocation7 + $0x1] ss:$8 sm:$0xf]  ;;  %v3375_v29 = vld [vmem:[#allocation4 + $0x144] ss:$8 sps:$4 sm:$0xff]  }
 0x153   :  { %v425_v21 = vmax.f32 %v421_v17, 0.0  ;;  %v427_v22 = vmax.f32 %v423_v18, 0.0  ;;  %v447_v33 = vshrl.u32 %v446_v31, 7  ;;  %v3378_v31 = vld [vmem:[#allocation4 + $0x154] ss:$8 sps:$4 sm:$0xff]  }
 0x154   :  { %v426_v23 = vmax.f32 %v422_v19, 0.0  ;;  %v428_v24 = vmax.f32 %v424_v20, 0.0  ;;  %v445_v32 = vunpack.c.0.s8 %v444_v30  ;;  %v3361_v20 = vld [vmem:[#allocation4 + $0x100] ss:$8 sps:$4 sm:$0xff]  }
 0x155   :  { %v429_v25 = vadd.f32 1e-05, %v425_v21  ;;  %v431_v26 = vadd.f32 1e-05, %v427_v22  ;;  %v3869_v45 = vsub.s32 0, %v447_v33  ;;  %v3872_v47 = vsub.s32 1, %v447_v33 }
 0x156   :  { %v430_v27 = vadd.f32 1e-05, %v426_v23  ;;  %v432_v28 = vadd.f32 1e-05, %v428_v24  ;;  %v3865_v36 = vsub.s32 %v445_v32, %v447_v33  ;;  %v3874_v48 = vsub.s32 2, %v447_v33 }
 0x157   :  { %3609 = vrsqrt.f32 %v429_v25  ;;  %v3876_v49 = vsub.s32 3, %v447_v33  ;;  %v3366_v22 = vld [vmem:[#allocation4 + $0x114] ss:$8 sps:$4 sm:$0xff]   ;;  %v3364_v24 = vld [vmem:[#allocation4 + $0x110] ss:$8 sps:$4 sm:$0xff]  }
 0x158   :  { %3611 = vrsqrt.f32 %v431_v26  ;;  %v3369_v25 = vld [vmem:[#allocation4 + $0x124] ss:$8 sps:$4 sm:$0xff]   ;;  %v3367_v26 = vld [vmem:[#allocation4 + $0x120] ss:$8 sps:$4 sm:$0xff]   ;;  %v3376_v32 = vld [vmem:[#allocation4 + $0x150] ss:$8 sps:$4 sm:$0xff]  }
 0x159   :  { %3613 = vrsqrt.f32 %v430_v27  ;;  %v3372_v27 = vld [vmem:[#allocation4 + $0x134] ss:$8 sps:$4 sm:$0xff]   ;;  %v3373_v30 = vld [vmem:[#allocation4 + $0x140] ss:$8 sps:$4 sm:$0xff]   ;;  %v3381_v33 = vld [vmem:[#allocation4 + $0x164] ss:$8 sps:$4 sm:$0xff]  }
 0x15a   :  { %3615 = vrsqrt.f32 %v432_v28  ;;  %v3370_v28 = vld [vmem:[#allocation4 + $0x130] ss:$8 sps:$4 sm:$0xff]  }
 0x161   :  { %v3610_v34 = vpop.eup %3609 }
 0x162   :  { %v3612_v35 = vpop.eup %3611 }
 0x163   :  { %v3614_v37 = vpop.eup %3613 }
 0x164   :  { %v3616_v38 = vpop.eup %3615  ;;  %v441_v39 = vcombine.low %v3610_v34, %v3614_v37  ;;  %v3379_v34 = vld [vmem:[#allocation4 + $0x160] ss:$8 sps:$4 sm:$0xff]   ;;  %v3382_v37 = vld [vmem:[#allocation4 + $0x170] ss:$8 sps:$4 sm:$0xff]  }
 0x165   :  { %v442_v40 = vcombine.low %v3612_v35, %v3616_v38  ;;  %v3384_v35 = vld [vmem:[#allocation4 + $0x174] ss:$8 sps:$4 sm:$0xff]   ;;  %v3387_v38 = vld [vmem:[#allocation4 + $0x184] ss:$8 sps:$4 sm:$0xff]  }
 0x166   :  { %v449_v41 = vrot.slane %v441_v39, %v3865_v36  ;;  %v3385_v39 = vld [vmem:[#allocation4 + $0x180] ss:$8 sps:$4 sm:$0xff]  }
 0x167   :  { %v456_v42 = vrot.slane %v442_v40, %v3865_v36  ;;  %v3390_v40 = vld [vmem:[#allocation4 + $0x194] ss:$8 sps:$4 sm:$0xff]  }
 0x169   :  { %v457_v43 = vcombine.low %v449_v41, %v456_v42  ;;  %v3388_v41 = vld [vmem:[#allocation4 + $0x190] ss:$8 sps:$4 sm:$0xff]   ;;  %v3393_v42 = vld [vmem:[#allocation4 + $0x1a4] ss:$8 sps:$4 sm:$0xff]  }
 0x16b   :  { %v464_v46 = vrot.slane %v457_v43, %v3865_v36  ;;  %v3391_v43 = vld [vmem:[#allocation4 + $0x1a0] ss:$8 sps:$4 sm:$0xff]  }
 0x16d   :  { %v466_v50 = vmul.f32 %v464_v46, %v354_v44  ;;  %v3396_v44 = vld [vmem:[#allocation4 + $0x1b4] ss:$8 sps:$4 sm:$0xff]   ;;  %v3394_v46 = vld [vmem:[#allocation4 + $0x1b0] ss:$8 sps:$4 sm:$0xff]  }
 0x16f   :  { %v479_v51 = vrot.slane %v466_v50, %v3874_v48  ;;  %v483_v52 = vrot.slane %v466_v50, %v3876_v49  ;;  %v471_v53 = vrot.slane %v466_v50, %v3869_v45  ;;  %v475_v54 = vrot.slane %v466_v50, %v3872_v47  ;;  %v3399_v50 = vld [vmem:[#allocation4 + $0x1c4] ss:$8 sps:$4 sm:$0xff]  }
 0x171   :  { %v490_v55 = vmul.f32 %v479_v51, %v411_v63  ;;  %v491_v56 = vmul.f32 %v483_v52, %v412_v6  ;;  %v525_v57 = vmul.f32 %v483_v52, %v3853_v11  ;;  %v488_v58 = vmul.f32 %v471_v53, %v409_v61  ;;  %v3402_v52 = vld [vmem:[#allocation4 + $0x1d4] ss:$8 sps:$4 sm:$0xff]  }
 0x172   :  { %v489_v59 = vmul.f32 %v475_v54, %v410_v2  ;;  %v523_v60 = vmul.f32 %v475_v54, %v3851_v10  ;;  %v522_v62 = vmul.f32 %v471_v53, %v3841_v4  ;;  %v524_v1 = vmul.f32 %v479_v51, %v3843_v5  ;;  %v3397_v51 = vld [vmem:[#allocation4 + $0x1c0] ss:$8 sps:$4 sm:$0xff]   ;;  %v3400_v53 = vld [vmem:[#allocation4 + $0x1d0] ss:$8 sps:$4 sm:$0xff]   ;;  %v3405_v54 = vld [vmem:[#allocation4 + $0x1e4] ss:$8 sps:$4 sm:$0xff]  }
 0x173   :  { %v497_v3 = vcombine.low %v490_v55, %v491_v56  ;;  %v3403_v55 = vld [vmem:[#allocation4 + $0x1e0] ss:$8 sps:$4 sm:$0xff]   ;;  %v3408_v56 = vld [vmem:[#allocation4 + $0x1f4] ss:$8 sps:$4 sm:$0xff]  }
 0x174   :  { %v496_v7 = vcombine.low %v488_v58, %v489_v59 }
 0x175   :  { %v511_v8 = vrot.slane %v497_v3, %v3865_v36  ;;  %v3412_v3 = vld [vmem:[#allocation6 + $0x8] sm:$0xff]  }
 0x176   :  { %v504_v9 = vrot.slane %v496_v7, %v3865_v36  ;;  %v3413_v7 = vld [vmem:[#allocation6 + $0x50] sm:$0xff]  }
 0x178   :  { %v512_v12 = vcombine.low %v504_v9, %v511_v8  ;;  %v3414_v8 = vld [vmem:[#allocation6 + $0x10] sm:$0xff]   ;;  %v3415_v9 = vld [vmem:[#allocation6 + $0x58] sm:$0xff]  }
 0x17a   :  { %v519_v63 = vrot.slane %v512_v12, %v3865_v36  ;;  %v3416_v12 = vld [vmem:[#allocation6 + $0x18] sm:$0xff]  }
 0x17c   :  { %v521_v6 = vsub.f32 %v356_v13, %v519_v63  ;;  %v3417_v13 = vld [vmem:[#allocation6 + $0x60] sm:$0xff]  }
 0x17d   :  { %v3418_v63 = vld [vmem:[#allocation6 + $0x20] sm:$0xff]  }
 0x17e   :  { %v534_v11 = vrot.slane %v521_v6, %v3872_v47  ;;  %v530_v61 = vrot.slane %v521_v6, %v3869_v45  ;;  %v542_v10 = vrot.slane %v521_v6, %v3876_v49  ;;  %v538_v4 = vrot.slane %v521_v6, %v3874_v48  ;;  %v3419_v6 = vld [vmem:[#allocation6 + $0x68] sm:$0xff]  }
 0x180   :  { %v548_v5 = vadd.f32 %v534_v11, %v523_v60  ;;  %v547_v2 = vadd.f32 %v530_v61, %v522_v62  ;;  %v550_v14 = vadd.f32 %v542_v10, %v525_v57  ;;  %v3893_v15 = vadd.f32 %v538_v4, %v524_v1  ;;  %v3406_v57 = vld [vmem:[#allocation4 + $0x1f0] ss:$8 sps:$4 sm:$0xff]   ;;  %v3409_v60 = vld [vmem:[#allocation6 + $0x40] sm:$0xff]   ;;  %v3411_v1 = vld [vmem:[#allocation6 + $0x48] sm:$0xff]  }
 0x181   :  { %v3410_v62 = vld [vmem:[#allocation6] sm:$0xff]   ;;  %3150 = vmatprep.subr.bf16.mxu1 %v3409_v60  ;;  %v3420_v11 = vld [vmem:[#allocation6 + $0x28] sm:$0xff]   ;;  %v3421_v61 = vld [vmem:[#allocation6 + $0x70] sm:$0xff]  }
 0x182   :  { %v552_v16 = vmax.f32 %v548_v5, 0.0  ;;  %v551_v17 = vmax.f32 %v547_v2, 0.0  ;;  %v554_v18 = vmax.f32 %v550_v14, 0.0  ;;  %v553_v58 = vmax.f32 %v3893_v15, 0.0  ;;  %3151 = vmatpush3.bf16.msra.mxu1 %v3410_v62  ;;  %v3422_v10 = vld [vmem:[#allocation6 + $0x30] sm:$0xff]   ;;  %v3423_v4 = vld [vmem:[#allocation6 + $0x78] sm:$0xff]  }
 0x183   :  { %3152 = vmatprep.subr.bf16.mxu1 %v3411_v1  ;;  %v3424_v5 = vld [vmem:[#allocation6 + $0x38] sm:$0xff]  }
 0x184   :  { %v556_v19 = vpack.c.bf16 %v552_v16, %v552_v16  ;;  %v555_v21 = vpack.c.bf16 %v551_v17, %v551_v17  ;;  %v558_v23 = vpack.c.bf16 %v554_v18, %v554_v18  ;;  %v557_v59 = vpack.c.bf16 %v553_v58, %v553_v58 }
 0x186   :  { %975 = vmatprep.mubr.bf16.mxu0 %v556_v19  ;;  %3153 = vmatpush3.bf16.msra.mxu1 %v3412_v3 }
 0x187   :  { %976 = vmatmul.mubr.bf16.vlgmr.msra.gmra.mrb[4].mxu0 %v555_v21  ;;  %3154 = vmatprep.subr.bf16.mxu1 %v3413_v7  ;;  %v1026_v7 = vld [vmem:[#allocation7 + $0x2] ss:$8 sm:$0x3] }
 0x188   :  { %985 = vmatpush1.bf16.msra.mxu0 %v3361_v20  ;;  %1016 = vmatprep.mubr.bf16.mxu0 %v558_v23 }
 0x189   :  { %986 = vmatprep.subr.bf16.mxu0 %v3366_v22 }
 0x18a   :  { %3155 = vmatpush3.bf16.msra.mxu1 %v3414_v8 }
 0x18b   :  { %3156 = vmatprep.subr.bf16.mxu1 %v3415_v9 }
 0x18c   :  { %987 = vmatpush1.bf16.msra.mxu0 %v3364_v24 }
 0x18d   :  { %988 = vmatprep.subr.bf16.mxu0 %v3369_v25 }
 0x18e   :  { %3157 = vmatpush3.bf16.msra.mxu1 %v3416_v12 }
 0x18f   :  { %3158 = vmatprep.subr.bf16.mxu1 %v3417_v13 }
 0x190   :  { %989 = vmatpush1.bf16.msra.mxu0 %v3367_v26 }
 0x191   :  { %990 = vmatprep.subr.bf16.mxu0 %v3372_v27 }
 0x192   :  { %3159 = vmatpush3.bf16.msra.mxu1 %v3418_v63 }
 0x193   :  { %3160 = vmatprep.subr.bf16.mxu1 %v3419_v6 }
 0x194   :  { %991 = vmatpush1.bf16.msra.mxu0 %v3370_v28 }
 0x195   :  { %992 = vmatprep.subr.bf16.mxu0 %v3375_v29 }
 0x196   :  { %3161 = vmatpush3.bf16.msra.mxu1 %v3420_v11 }
 0x197   :  { %3162 = vmatprep.subr.bf16.mxu1 %v3421_v61 }
 0x198   :  { %993 = vmatpush1.bf16.msra.mxu0 %v3373_v30 }
 0x199   :  { %994 = vmatprep.subr.bf16.mxu0 %v3378_v31 }
 0x19a   :  { %3163 = vmatpush3.bf16.msra.mxu1 %v3422_v10 }
 0x19b   :  { %3164 = vmatprep.subr.bf16.mxu1 %v3423_v4 }
 0x19c   :  { %995 = vmatpush1.bf16.msra.mxu0 %v3376_v32 }
 0x19d   :  { %996 = vmatprep.subr.bf16.mxu0 %v3381_v33 }
 0x19e   :  { %3165 = vmatpush3.bf16.msra.mxu1 %v3424_v5  ;;  %v1028_v5 = vld [vmem:[#allocation7 + $0x3] ss:$8 sm:$0x3] }
 0x1a0   :  { %997 = vmatpush1.bf16.msra.mxu0 %v3379_v34 }
 0x1a1   :  { %998 = vmatprep.subr.bf16.mxu0 %v3384_v35 }
 0x1a4   :  { %999 = vmatpush1.bf16.msra.mxu0 %v3382_v37 }
 0x1a5   :  { %1000 = vmatprep.subr.bf16.mxu0 %v3387_v38 }
 0x1a8   :  { %1001 = vmatpush1.bf16.msra.mxu0 %v3385_v39 }
 0x1a9   :  { %1002 = vmatprep.subr.bf16.mxu0 %v3390_v40 }
 0x1ac   :  { %1003 = vmatpush1.bf16.msra.mxu0 %v3388_v41 }
 0x1ad   :  { %1004 = vmatprep.subr.bf16.mxu0 %v3393_v42 }
 0x1b0   :  { %1005 = vmatpush1.bf16.msra.mxu0 %v3391_v43 }
 0x1b1   :  { %1006 = vmatprep.subr.bf16.mxu0 %v3396_v44 }
 0x1b4   :  { %1007 = vmatpush1.bf16.msra.mxu0 %v3394_v46 }
 0x1b5   :  { %1008 = vmatprep.subr.bf16.mxu0 %v3399_v50 }
 0x1b8   :  { %1009 = vmatpush1.bf16.msra.mxu0 %v3397_v51 }
 0x1b9   :  { %1010 = vmatprep.subr.bf16.mxu0 %v3402_v52 }
 0x1bc   :  { %1011 = vmatpush1.bf16.msra.mxu0 %v3400_v53 }
 0x1bd   :  { %1012 = vmatprep.subr.bf16.mxu0 %v3405_v54 }
 0x1c0   :  { %1013 = vmatpush1.bf16.msra.mxu0 %v3403_v55 }
 0x1c1   :  { %1014 = vmatprep.subr.bf16.mxu0 %v3408_v56 }
 0x1c4   :  { %1015 = vmatpush1.bf16.msra.mxu0 %v3406_v57 }
 0x1c7   :  { %1017 = vmatmul.mubr.bf16.vlgmr.msra.gmra.mrb[4].mxu0 %v557_v59 }
 0x29a   :  { %v1018_v2 = vpop.f32.mrb[4].mxu0 }
 0x29b   :  { %v1029_v14 = vrot.slane %v1018_v2, 4  ;;  %v1041_v15 = vmul.f32 %v1018_v2, %v1018_v2  ;;  %v1020_v16 = vpop.f32.mrb[5].mxu0 }
 0x29c   :  { %v1035_v17 = vrot.slane %v1020_v16, 4  ;;  %v1042_v18 = vmul.f32 %v1020_v16, %v1020_v16  ;;  %v1022_v19 = vpop.f32.mrb[6].mxu0 }
 0x29d   :  { %v1030_v20 = vadd.f32 %v1029_v14, %v1018_v2  ;;  %v1043_v21 = vrot.slane %v1041_v15, 4  ;;  %v1023_v22 = vpop.f32.mrb[7].mxu0 }
 0x29e   :  { %v1036_v23 = vadd.f32 %v1035_v17, %v1020_v16  ;;  %v1049_v24 = vrot.slane %v1042_v18, 4 }
 0x29f   :  { %v1031_v25 = vrot.slane %v1030_v20, 2  ;;  %v1044_v26 = vadd.f32 %v1043_v21, %v1041_v15 }
 0x2a0   :  { %v1037_v27 = vrot.slane %v1036_v23, 2  ;;  %v1050_v28 = vadd.f32 %v1049_v24, %v1042_v18 }
 0x2a1   :  { %v1032_v29 = vadd.f32 %v1031_v25, %v1030_v20  ;;  %v1045_v30 = vrot.slane %v1044_v26, 2  ;;  %v3430_v25 = vld [vmem:[#allocation4 + $0x294] ss:$8 sps:$4 sm:$0xff]  }
 0x2a2   :  { %v1038_v31 = vadd.f32 %v1037_v27, %v1036_v23  ;;  %v1051_v32 = vrot.slane %v1050_v28, 2  ;;  %v3433_v27 = vld [vmem:[#allocation4 + $0x2a4] ss:$8 sps:$4 sm:$0xff]  }
 0x2a3   :  { %v1033_v33 = vrot.slane %v1032_v29, 1  ;;  %v1046_v34 = vadd.f32 %v1045_v30, %v1044_v26  ;;  %v3428_v26 = vld [vmem:[#allocation4 + $0x290] ss:$8 sps:$4 sm:$0xff]  }
 0x2a4   :  { %v1039_v35 = vrot.slane %v1038_v31, 1  ;;  %v1052_v37 = vadd.f32 %v1051_v32, %v1050_v28  ;;  %v3431_v28 = vld [vmem:[#allocation4 + $0x2a0] ss:$8 sps:$4 sm:$0xff]   ;;  %v3434_v30 = vld [vmem:[#allocation4 + $0x2b0] ss:$8 sps:$4 sm:$0xff]  }
 0x2a5   :  { %v1034_v38 = vadd.f32 %v1033_v33, %v1032_v29  ;;  %v1047_v39 = vrot.slane %v1046_v34, 1  ;;  %v3436_v29 = vld [vmem:[#allocation4 + $0x2b4] ss:$8 sps:$4 sm:$0xff]   ;;  %v3437_v32 = vld [vmem:[#allocation4 + $0x2c0] ss:$8 sps:$4 sm:$0xff]  }
 0x2a6   :  { %v1040_v40 = vadd.f32 %v1039_v35, %v1038_v31  ;;  %v1053_v41 = vrot.slane %v1052_v37, 1  ;;  %v3439_v31 = vld [vmem:[#allocation4 + $0x2c4] ss:$8 sps:$4 sm:$0xff]   ;;  %v3442_v33 = vld [vmem:[#allocation4 + $0x2d4] ss:$8 sps:$4 sm:$0xff]  }
 0x2a7   :  { %v1048_v42 = vadd.f32 %v1047_v39, %v1046_v34  ;;  %v1055_v43 = vmul.f32 0.125, %v1034_v38  ;;  %v3440_v34 = vld [vmem:[#allocation4 + $0x2d0] ss:$8 sps:$4 sm:$0xff]   ;;  %v3443_v35 = vld [vmem:[#allocation4 + $0x2e0] ss:$8 sps:$4 sm:$0xff]  }
 0x2a8   :  { %v1054_v44 = vadd.f32 %v1053_v41, %v1052_v37  ;;  %v1056_v46 = vmul.f32 0.125, %v1040_v40  ;;  %v3445_v37 = vld [vmem:[#allocation4 + $0x2e4] ss:$8 sps:$4 sm:$0xff]   ;;  %v3448_v38 = vld [vmem:[#allocation4 + $0x2f4] ss:$8 sps:$4 sm:$0xff]   ;;  %v3751_v40 = vmov 0.0  }
 0x2a9   :  { %v1057_v50 = vmul.f32 0.125, %v1048_v42  ;;  %v1059_v51 = vmul.f32 %v1055_v43, %v1055_v43  ;;  %v3446_v39 = vld [vmem:[#allocation4 + $0x2f0] ss:$8 sps:$4 sm:$0xff]  }
 0x2aa   :  { %v1058_v52 = vmul.f32 0.125, %v1054_v44  ;;  %v1060_v53 = vmul.f32 %v1056_v46, %v1056_v46 }
 0x2ab   :  { %v1061_v54 = vsub.f32 %v1057_v50, %v1059_v51 }
 0x2ac   :  { %v1062_v55 = vsub.f32 %v1058_v52, %v1060_v53 }
 0x2ad   :  { %v1063_v56 = vmax.f32 %v1061_v54, 0.0 }
 0x2ae   :  { %v1064_v57 = vmax.f32 %v1062_v55, 0.0 }
 0x2af   :  { %v1065_v58 = vadd.f32 1e-05, %v1063_v56 }
 0x2b0   :  { %v1066_v59 = vadd.f32 1e-05, %v1064_v57 }
 0x2b1   :  { %3617 = vrsqrt.f32 %v1065_v58 }
 0x2b2   :  { %3619 = vrsqrt.f32 %v1066_v59 }
 0x2bb   :  { %v3618_v60 = vpop.eup %3617 }
 0x2bc   :  { %v3620_v62 = vpop.eup %3619 }
 0x2bd   :  { %v1071_v1 = vcombine.low %v3618_v60, %v3620_v62 }
 0x2bf   :  { %v1078_v3 = vrot.slane %v1071_v1, %v3865_v36 }
 0x2c1   :  { %v1085_v8 = vrot.slane %v1078_v3, %v3865_v36 }
 0x2c3   :  { %v1087_v9 = vmul.f32 %v1085_v8, %v1026_v7 }
 0x2c5   :  { %v1092_v12 = vrot.slane %v1087_v9, %v3869_v45  ;;  %v1096_v13 = vrot.slane %v1087_v9, %v3872_v47 }
 0x2c7   :  { %v1099_v63 = vmul.f32 %v1092_v12, %v1055_v43  ;;  %v1100_v6 = vmul.f32 %v1096_v13, %v1056_v46  ;;  %v1121_v11 = vmul.f32 %v1096_v13, %v1020_v16  ;;  %v1120_v61 = vmul.f32 %v1092_v12, %v1018_v2  ;;  %v3427_v2 = vld [vmem:[#allocation4 + $0x284] ss:$8 sps:$4 sm:$0xff]   ;;  %v3425_v16 = vld [vmem:[#allocation4 + $0x280] ss:$8 sps:$4 sm:$0xff]  }
 0x2c8   :  { %1445 = vmatprep.subr.bf16.mxu1 %v3427_v2  ;;  %v3456_v2 = vld [vmem:[#allocation6 + $0xb8] sm:$0xff]  }
 0x2c9   :  { %v1103_v10 = vcombine.low %v1099_v63, %v1100_v6  ;;  %v1307_v63 = vld [vmem:[#allocation7 + $0x4] ss:$0 sm:$0xff] }
 0x2cb   :  { %v1110_v4 = vrot.slane %v1103_v10, %v3865_v36 }
 0x2cd   :  { %v1117_v14 = vrot.slane %v1110_v4, %v3865_v36 }
 0x2cf   :  { %v1119_v15 = vsub.f32 %v1028_v5, %v1117_v14 }
 0x2d1   :  { %v1130_v17 = vrot.slane %v1119_v15, %v3872_v47  ;;  %v1126_v18 = vrot.slane %v1119_v15, %v3869_v45 }
 0x2d3   :  { %v1134_v19 = vadd.f32 %v1130_v17, %v1121_v11  ;;  %v1133_v20 = vadd.f32 %v1126_v18, %v1120_v61  ;;  %v1308_v61 = vld [vmem:[#allocation7 + $0x5] ss:$0 sm:$0xff] }
 0x2d4   :  { %v3449_v17 = vld [vmem:[#allocation6 + $0x80] sm:$0xff]  }
 0x2d5   :  { %v1136_v21 = vmax.f32 %v1134_v19, 0.0  ;;  %v1135_v22 = vmax.f32 %v1133_v20, 0.0  ;;  %v3450_v19 = vld [vmem:[#allocation6 + $0x88] sm:$0xff]   ;;  %v3451_v20 = vld [vmem:[#allocation6 + $0x90] sm:$0xff]  }
 0x2d7   :  { %v1138_v23 = vpack.c.bf16 %v1136_v21, %v1136_v21  ;;  %v1137_v24 = vpack.c.bf16 %v1135_v22, %v1135_v22  ;;  %v3452_v21 = vld [vmem:[#allocation6 + $0x98] sm:$0xff]   ;;  %v3453_v22 = vld [vmem:[#allocation6 + $0xa0] sm:$0xff]  }
 0x2d9   :  { %1299 = vmatprep.mubr.bf16.mxu1 %v1138_v23  ;;  %v3454_v23 = vld [vmem:[#allocation6 + $0xa8] sm:$0xff]  }
 0x2da   :  { %1300 = vmatmul.mubr.bf16.vlgmr.msra.gmra.mrb[4].mxu1 %v1137_v24  ;;  %v3455_v24 = vld [vmem:[#allocation6 + $0xb0] sm:$0xff]  }
 0x2db   :  { %1477 = vmatprep.mubr.bf16.mxu1 %v3749_v0  ;;  %1446 = vmatpush1.bf16.msra.mxu1 %v3425_v16  ;;  %v1353_v16 = vld [vmem:[#allocation7 + $0x6] ss:$8 sm:$0x3] }
 0x2dc   :  { %1447 = vmatprep.subr.bf16.mxu1 %v3430_v25  ;;  %v1362_v25 = vrot.slane %v1353_v16, %v3872_v47 }
 0x2df   :  { %1448 = vmatpush1.bf16.msra.mxu1 %v3428_v26 }
 0x2e0   :  { %1449 = vmatprep.subr.bf16.mxu1 %v3433_v27 }
 0x2e3   :  { %1450 = vmatpush1.bf16.msra.mxu1 %v3431_v28 }
 0x2e4   :  { %1451 = vmatprep.subr.bf16.mxu1 %v3436_v29 }
 0x2e7   :  { %1452 = vmatpush1.bf16.msra.mxu1 %v3434_v30 }
 0x2e8   :  { %1453 = vmatprep.subr.bf16.mxu1 %v3439_v31 }
 0x2eb   :  { %1454 = vmatpush1.bf16.msra.mxu1 %v3437_v32  ;;  %v1358_v32 = vrot.slane %v1353_v16, %v3869_v45 }
 0x2ec   :  { %1455 = vmatprep.subr.bf16.mxu1 %v3442_v33 }
 0x2ef   :  { %1456 = vmatpush1.bf16.msra.mxu1 %v3440_v34  ;;  %v1489_v34 = vld [vmem:[%s3968_s1] sm:$0xff] }
 0x2f0   :  { %1457 = vmatprep.subr.bf16.mxu1 %v3445_v37 }
 0x2f3   :  { %1458 = vmatpush1.bf16.msra.mxu1 %v3443_v35 }
 0x2f4   :  { %1459 = vmatprep.subr.bf16.mxu1 %v3448_v38 }
 0x2f7   :  { %1460 = vmatpush1.bf16.msra.mxu1 %v3446_v39 }
 0x2f8   :  { %3225 = vmatprep.subr.bf16.mxu1 %v3751_v40 }
 0x3ad   :  { %v3166_v41 = vpop.f32.mrb[4].mxu1 }
 0x3ae   :  { %v3167_v42 = vpop.f32.mrb[5].mxu1 }
 0x3af   :  { %v3168_v43 = vadd.f32 %v3167_v42, %v3166_v41  ;;  %v3169_v44 = vpop.f32.mrb[6].mxu1  ;;  %v3459_v41 = vld [vmem:[#allocation4 + $0x204] ss:$8 sps:$4 sm:$0xff]   ;;  %v3457_v42 = vld [vmem:[#allocation4 + $0x200] ss:$8 sps:$4 sm:$0xff]  }
 0x3b0   :  { %v3170_v46 = vpop.f32.mrb[7].mxu1  ;;  %v3460_v44 = vld [vmem:[#allocation4 + $0x210] ss:$8 sps:$4 sm:$0xff]  }
 0x3b1   :  { %v1309_v50 = vrot.slane %v3168_v43, 4  ;;  %v1315_v51 = vmul.f32 %v3168_v43, %v3168_v43  ;;  %v3465_v46 = vld [vmem:[#allocation4 + $0x224] ss:$8 sps:$4 sm:$0xff]  }
 0x3b3   :  { %v1310_v52 = vadd.f32 %v3168_v43, %v1309_v50  ;;  %v1316_v53 = vrot.slane %v1315_v51, 4  ;;  %v3463_v50 = vld [vmem:[#allocation4 + $0x220] ss:$8 sps:$4 sm:$0xff]  }
 0x3b5   :  { %v1311_v54 = vrot.slane %v1310_v52, 2  ;;  %v1317_v55 = vadd.f32 %v1316_v53, %v1315_v51  ;;  %v3468_v51 = vld [vmem:[#allocation4 + $0x234] ss:$8 sps:$4 sm:$0xff]   ;;  %v3471_v53 = vld [vmem:[#allocation4 + $0x244] ss:$8 sps:$4 sm:$0xff]  }
 0x3b7   :  { %v1312_v56 = vadd.f32 %v1311_v54, %v1310_v52  ;;  %v1318_v57 = vrot.slane %v1317_v55, 2  ;;  %v3466_v52 = vld [vmem:[#allocation4 + $0x230] ss:$8 sps:$4 sm:$0xff]   ;;  %v3469_v54 = vld [vmem:[#allocation4 + $0x240] ss:$8 sps:$4 sm:$0xff]  }
 0x3b9   :  { %v1313_v58 = vrot.slane %v1312_v56, 1  ;;  %v1319_v59 = vadd.f32 %v1318_v57, %v1317_v55  ;;  %v3472_v55 = vld [vmem:[#allocation4 + $0x250] ss:$8 sps:$4 sm:$0xff]   ;;  %v3475_v57 = vld [vmem:[#allocation4 + $0x260] ss:$8 sps:$4 sm:$0xff]  }
 0x3bb   :  { %v1314_v60 = vadd.f32 %v1313_v58, %v1312_v56  ;;  %v1320_v62 = vrot.slane %v1319_v59, 1  ;;  %v3477_v56 = vld [vmem:[#allocation4 + $0x264] ss:$8 sps:$4 sm:$0xff]   ;;  %v3478_v58 = vld [vmem:[#allocation4 + $0x270] ss:$8 sps:$4 sm:$0xff]  }
 0x3bd   :  { %v1321_v1 = vadd.f32 %v1320_v62, %v1319_v59  ;;  %v1322_v3 = vmul.f32 0.125, %v1314_v60  ;;  %v3480_v59 = vld [vmem:[#allocation4 + $0x274] ss:$8 sps:$4 sm:$0xff]  }
 0x3bf   :  { %v1323_v7 = vmul.f32 0.125, %v1321_v1  ;;  %v1324_v8 = vmul.f32 %v1322_v3, %v1322_v3 }
 0x3c1   :  { %v1325_v9 = vsub.f32 %v1323_v7, %v1324_v8 }
 0x3c3   :  { %v1326_v12 = vmax.f32 %v1325_v9, 0.0 }
 0x3c5   :  { %v1327_v13 = vadd.f32 1e-05, %v1326_v12 }
 0x3c7   :  { %3621 = vrsqrt.f32 %v1327_v13 }
 0x3d1   :  { %v3622_v6 = vpop.eup %3621 }
 0x3d2   :  { %v1329_v11 = vmul.f32 %v3622_v6, %v1307_v63 }
 0x3d4   :  { %v1330_v10 = vmul.f32 %v1329_v11, %v1322_v3  ;;  %v1332_v4 = vmul.f32 %v3168_v43, %v1329_v11  ;;  %v3462_v43 = vld [vmem:[#allocation4 + $0x214] ss:$8 sps:$4 sm:$0xff]  }
 0x3d6   :  { %v1331_v5 = vsub.f32 %v1308_v61, %v1330_v10 }
 0x3d8   :  { %v1333_v14 = vadd.f32 %v1332_v4, %v1331_v5 }
 0x3da   :  { %v1334_v15 = vmax.f32 %v1333_v14, 0.0 }
 0x3dc   :  { %v1335_v18 = vpack.c.bf16 %v1334_v15, %v1334_v15 }
 0x3de   :  { %1478 = vmatmul.mubr.bf16.vlgmr.msra.gmra.mrb[8].mxu1 %v1335_v18 }
 0x3df   :  { %3226 = vmatpush3.bf16.msra.mxu1 %v3449_v17  ;;  %3241 = vmatprep.mubr.msk.bf16.mxu1 %vm3752_vm0, %v3751_v40 }
 0x3e0   :  { %3227 = vmatprep.subr.bf16.mxu1 %v3751_v40 }
 0x3e3   :  { %3228 = vmatpush3.bf16.msra.mxu1 %v3450_v19 }
 0x3e4   :  { %3229 = vmatprep.subr.bf16.mxu1 %v3751_v40 }
 0x3e7   :  { %3230 = vmatpush3.bf16.msra.mxu1 %v3451_v20 }
 0x3e8   :  { %3231 = vmatprep.subr.bf16.mxu1 %v3751_v40 }
 0x3eb   :  { %3232 = vmatpush3.bf16.msra.mxu1 %v3452_v21 }
 0x3ec   :  { %3233 = vmatprep.subr.bf16.mxu1 %v3751_v40 }
 0x3ef   :  { %3234 = vmatpush3.bf16.msra.mxu1 %v3453_v22  ;;  %v1597_v22 = vld [vmem:[#allocation7 + $0x7] ss:$0 sm:$0xff] }
 0x3f0   :  { %3235 = vmatprep.subr.bf16.mxu1 %v3751_v40 }
 0x3f3   :  { %3236 = vmatpush3.bf16.msra.mxu1 %v3454_v23 }
 0x3f4   :  { %3237 = vmatprep.subr.bf16.mxu1 %v3751_v40 }
 0x3f7   :  { %3238 = vmatpush3.bf16.msra.mxu1 %v3455_v24 }
 0x3f8   :  { %3239 = vmatprep.subr.bf16.mxu1 %v3751_v40 }
 0x3fb   :  { %3240 = vmatpush3.bf16.msra.mxu1 %v3456_v2  ;;  %v1598_v2 = vld [vmem:[#allocation7 + $0x20] ss:$0 sm:$0xff] }
 0x3fc   :  { %1722 = vmatprep.subr.bf16.mxu1 %v3459_v41  ;;  %v3493_v41 = vld [vmem:[#allocation2 + $0x140] ss:$16 sps:$4 sm:$0xff]  }
 0x4b1   :  { %v1479_v26 = vpop.f32.mrb[8].mxu1 }
 0x4b2   :  { %v1481_v27 = vpop.f32.mrb[9].mxu1  ;;  %v1480_v37 = vadd.f32 %v1479_v26, %v1358_v32  ;;  %v3481_v32 = vld [vmem:[#allocation2 + $0x100] ss:$16 sps:$4 sm:$0xff]  }
 0x4b3   :  { %v1482_v28 = vadd.f32 %v1481_v27, %v1362_v25  ;;  %v1483_v29 = vpop.f32.mrb[10].mxu1 }
 0x4b4   :  { %v1484_v30 = vpop.f32.mrb[11].mxu1 }
 0x4b5   :  { %v1486_v31 = vmul.f32 1.442695, %v1482_v28  ;;  %v3483_v30 = vld [vmem:[#allocation2 + $0x104] ss:$16 sps:$4 sm:$0xff]  }
 0x4b6   :  { %2261 = vmatprep.subr.bf16.mxu0 %v3483_v30  ;;  %v3568_v30 = vld [vmem:[#allocation2 + $0x2c8] ss:$16 sps:$4 sm:$0xff]  }
 0x4b7   :  { %3623 = vpow2.f32 %v1486_v31  ;;  %v3486_v31 = vld [vmem:[#allocation2 + $0x10c] ss:$16 sps:$4 sm:$0xff]   ;;  %2262 = vmatpush1.bf16.msra.mxu0 %v3481_v32 }
 0x4b8   :  { %v3576_v32 = vld [vmem:[#allocation2 + $0x2ec] ss:$16 sps:$4 sm:$0xff]  }
 0x4c1   :  { %v3624_v33 = vpop.eup %3623 }
 0x4c2   :  { %v1488_v35 = vmul.f32 0.5, %v3624_v33  ;;  %v3484_v33 = vld [vmem:[#allocation2 + $0x108] ss:$16 sps:$4 sm:$0xff]  }
 0x4c4   :  { %v1490_v38 = vmul.f32 %v1489_v34, %v1488_v35  ;;  %v3489_v34 = vld [vmem:[#allocation2 + $0x124] ss:$16 sps:$4 sm:$0xff]   ;;  %v3492_v35 = vld [vmem:[#allocation2 + $0x12c] ss:$16 sps:$4 sm:$0xff]  }
 0x4c5   :  { %2263 = vmatprep.subr.bf16.mxu0 %v3489_v34  ;;  %v3574_v34 = vld [vmem:[#allocation2 + $0x2e8] ss:$16 sps:$4 sm:$0xff]  }
 0x4c6   :  { %v1491_v39 = vadd.f32 %v1490_v38, %v1480_v37  ;;  %v3487_v37 = vld [vmem:[#allocation2 + $0x120] ss:$16 sps:$4 sm:$0xff]   ;;  %v3490_v38 = vld [vmem:[#allocation2 + $0x128] ss:$16 sps:$4 sm:$0xff]  }
 0x4c7   :  { %2264 = vmatpush1.bf16.msra.mxu0 %v3487_v37 }
 0x4c8   :  { %2893 = vst [vmem:[%s3973_s6 + $0x8] sm:$0xff] %v1491_v39  ;;  %v1492_v40 = vpack.c.bf16 %v1491_v39, %v1491_v39  ;;  %v3495_v39 = vld [vmem:[#allocation2 + $0x144] ss:$16 sps:$4 sm:$0xff]  }
 0x4c9   :  { %2265 = vmatprep.subr.bf16.mxu0 %v3495_v39 }
 0x4ca   :  { %3242 = vmatmul.mubr.bf16.vlgmr.msra.gmra.mrb[12].mxu1 %v1492_v40  ;;  %v3498_v40 = vld [vmem:[#allocation2 + $0x14c] ss:$16 sps:$4 sm:$0xff]  }
 0x4cb   :  { %1754 = vmatprep.mubr.bf16.mxu1 %v3749_v0  ;;  %1723 = vmatpush1.bf16.msra.mxu1 %v3457_v42  ;;  %v3474_v0 = vld [vmem:[#allocation4 + $0x254] ss:$8 sps:$4 sm:$0xff]   ;;  %v3496_v42 = vld [vmem:[#allocation2 + $0x148] ss:$16 sps:$4 sm:$0xff]  }
 0x4cc   :  { %1724 = vmatprep.subr.bf16.mxu1 %v3462_v43  ;;  %2266 = vmatpush1.bf16.msra.mxu0 %v3493_v41  ;;  %v3501_v43 = vld [vmem:[#allocation2 + $0x164] ss:$16 sps:$4 sm:$0xff]  }
 0x4cd   :  { %2267 = vmatprep.subr.bf16.mxu0 %v3501_v43 }
 0x4cf   :  { %1725 = vmatpush1.bf16.msra.mxu1 %v3460_v44  ;;  %v3504_v44 = vld [vmem:[#allocation2 + $0x16c] ss:$16 sps:$4 sm:$0xff]  }
 0x4d0   :  { %1726 = vmatprep.subr.bf16.mxu1 %v3465_v46  ;;  %v3499_v46 = vld [vmem:[#allocation2 + $0x160] ss:$16 sps:$4 sm:$0xff]  }
 0x4d1   :  { %2268 = vmatpush1.bf16.msra.mxu0 %v3499_v46 }
 0x4d3   :  { %1727 = vmatpush1.bf16.msra.mxu1 %v3463_v50  ;;  %v3502_v50 = vld [vmem:[#allocation2 + $0x168] ss:$16 sps:$4 sm:$0xff]  }
 0x4d4   :  { %1728 = vmatprep.subr.bf16.mxu1 %v3468_v51  ;;  %v3507_v51 = vld [vmem:[#allocation2 + $0x184] ss:$16 sps:$4 sm:$0xff]  }
 0x4d5   :  { %2269 = vmatprep.subr.bf16.mxu0 %v3507_v51 }
 0x4d7   :  { %1729 = vmatpush1.bf16.msra.mxu1 %v3466_v52  ;;  %v3510_v52 = vld [vmem:[#allocation2 + $0x18c] ss:$16 sps:$4 sm:$0xff]  }
 0x4d8   :  { %1730 = vmatprep.subr.bf16.mxu1 %v3471_v53  ;;  %v3505_v53 = vld [vmem:[#allocation2 + $0x180] ss:$16 sps:$4 sm:$0xff]  }
 0x4d9   :  { %2270 = vmatpush1.bf16.msra.mxu0 %v3505_v53 }
 0x4db   :  { %1731 = vmatpush1.bf16.msra.mxu1 %v3469_v54  ;;  %v3508_v54 = vld [vmem:[#allocation2 + $0x188] ss:$16 sps:$4 sm:$0xff]  }
 0x4dc   :  { %1732 = vmatprep.subr.bf16.mxu1 %v3474_v0  ;;  %v3513_v0 = vld [vmem:[#allocation2 + $0x1a4] ss:$16 sps:$4 sm:$0xff]  }
 0x4dd   :  { %2271 = vmatprep.subr.bf16.mxu0 %v3513_v0 }
 0x4df   :  { %1733 = vmatpush1.bf16.msra.mxu1 %v3472_v55  ;;  %v3516_v55 = vld [vmem:[#allocation2 + $0x1ac] ss:$16 sps:$4 sm:$0xff]  }
 0x4e0   :  { %1734 = vmatprep.subr.bf16.mxu1 %v3477_v56  ;;  %v3511_v56 = vld [vmem:[#allocation2 + $0x1a0] ss:$16 sps:$4 sm:$0xff]  }
 0x4e1   :  { %2272 = vmatpush1.bf16.msra.mxu0 %v3511_v56 }
 0x4e3   :  { %1735 = vmatpush1.bf16.msra.mxu1 %v3475_v57  ;;  %v3514_v57 = vld [vmem:[#allocation2 + $0x1a8] ss:$16 sps:$4 sm:$0xff]  }
 0x4e4   :  { %1736 = vmatprep.subr.bf16.mxu1 %v3480_v59  ;;  %v3522_v59 = vld [vmem:[#allocation2 + $0x1cc] ss:$16 sps:$4 sm:$0xff]  }
 0x4e7   :  { %1737 = vmatpush1.bf16.msra.mxu1 %v3478_v58  ;;  %v3519_v58 = vld [vmem:[#allocation2 + $0x1c4] ss:$16 sps:$4 sm:$0xff]  }
 0x4e8   :  { %2302 = vmatprep.subr.bf16.mxu1 %v3486_v31  ;;  %2273 = vmatprep.subr.bf16.mxu0 %v3519_v58  ;;  %v3573_v31 = vld [vmem:[#allocation2 + $0x2e4] ss:$16 sps:$4 sm:$0xff]  }
 0x59d   :  { %v1591_v60 = vpop.f32.mrb[12].mxu1 }
 0x59e   :  { %v1599_v62 = vrot.slane %v1591_v60, 4  ;;  %v1605_v1 = vmul.f32 %v1591_v60, %v1591_v60  ;;  %v3243_v3 = vpop.f32.mrb[13].mxu1 }
 0x59f   :  { %v1594_v7 = vpop.f32.mrb[14].mxu1  ;;  %v3528_v3 = vld [vmem:[#allocation2 + $0x1ec] ss:$16 sps:$4 sm:$0xff]  }
 0x5a0   :  { %v1600_v8 = vadd.f32 %v1599_v62, %v1591_v60  ;;  %v1606_v9 = vrot.slane %v1605_v1, 4  ;;  %v3244_v12 = vpop.f32.mrb[15].mxu1  ;;  %v3520_v62 = vld [vmem:[#allocation2 + $0x1c8] ss:$16 sps:$4 sm:$0xff]   ;;  %v3523_v7 = vld [vmem:[#allocation2 + $0x1e0] ss:$16 sps:$4 sm:$0xff]  }
 0x5a1   :  { %v3534_v12 = vld [vmem:[#allocation2 + $0x20c] ss:$16 sps:$4 sm:$0xff]  }
 0x5a2   :  { %v1601_v13 = vrot.slane %v1600_v8, 2  ;;  %v1607_v63 = vadd.f32 %v1606_v9, %v1605_v1  ;;  %v3525_v1 = vld [vmem:[#allocation2 + $0x1e4] ss:$16 sps:$4 sm:$0xff]  }
 0x5a3   :  { %v3531_v9 = vld [vmem:[#allocation2 + $0x204] ss:$16 sps:$4 sm:$0xff]  }
 0x5a4   :  { %v1602_v6 = vadd.f32 %v1601_v13, %v1600_v8  ;;  %v1608_v11 = vrot.slane %v1607_v63, 2  ;;  %v3526_v8 = vld [vmem:[#allocation2 + $0x1e8] ss:$16 sps:$4 sm:$0xff]   ;;  %v3529_v13 = vld [vmem:[#allocation2 + $0x200] ss:$16 sps:$4 sm:$0xff]  }
 0x5a6   :  { %v1603_v61 = vrot.slane %v1602_v6, 1  ;;  %v1609_v10 = vadd.f32 %v1608_v11, %v1607_v63  ;;  %v3532_v63 = vld [vmem:[#allocation2 + $0x208] ss:$16 sps:$4 sm:$0xff]   ;;  %v3540_v11 = vld [vmem:[#allocation2 + $0x22c] ss:$16 sps:$4 sm:$0xff]  }
 0x5a8   :  { %v1604_v4 = vadd.f32 %v1603_v61, %v1602_v6  ;;  %v1610_v5 = vrot.slane %v1609_v10, 1  ;;  %v3537_v6 = vld [vmem:[#allocation2 + $0x224] ss:$16 sps:$4 sm:$0xff]   ;;  %v3535_v61 = vld [vmem:[#allocation2 + $0x220] ss:$16 sps:$4 sm:$0xff]  }
 0x5aa   :  { %v1611_v14 = vadd.f32 %v1610_v5, %v1609_v10  ;;  %v1612_v15 = vmul.f32 0.125, %v1604_v4  ;;  %v3538_v10 = vld [vmem:[#allocation2 + $0x228] ss:$16 sps:$4 sm:$0xff]   ;;  %v3543_v4 = vld [vmem:[#allocation2 + $0x244] ss:$16 sps:$4 sm:$0xff]  }
 0x5ab   :  { %v3546_v5 = vld [vmem:[#allocation2 + $0x24c] ss:$16 sps:$4 sm:$0xff]  }
 0x5ac   :  { %v1613_v17 = vmul.f32 0.125, %v1611_v14  ;;  %v1614_v18 = vmul.f32 %v1612_v15, %v1612_v15  ;;  %v3541_v14 = vld [vmem:[#allocation2 + $0x240] ss:$16 sps:$4 sm:$0xff]  }
 0x5ae   :  { %v1615_v19 = vsub.f32 %v1613_v17, %v1614_v18  ;;  %v3549_v17 = vld [vmem:[#allocation2 + $0x264] ss:$16 sps:$4 sm:$0xff]   ;;  %v3552_v18 = vld [vmem:[#allocation2 + $0x26c] ss:$16 sps:$4 sm:$0xff]  }
 0x5b0   :  { %v1616_v20 = vmax.f32 %v1615_v19, 0.0  ;;  %v3547_v19 = vld [vmem:[#allocation2 + $0x260] ss:$16 sps:$4 sm:$0xff]  }
 0x5b2   :  { %v1617_v21 = vadd.f32 1e-05, %v1616_v20  ;;  %v3550_v20 = vld [vmem:[#allocation2 + $0x268] ss:$16 sps:$4 sm:$0xff]  }
 0x5b4   :  { %3625 = vrsqrt.f32 %v1617_v21  ;;  %v3555_v21 = vld [vmem:[#allocation2 + $0x284] ss:$16 sps:$4 sm:$0xff]  }
 0x5be   :  { %v3626_v23 = vpop.eup %3625 }
 0x5bf   :  { %v1619_v24 = vmul.f32 %v3626_v23, %v1597_v22  ;;  %v3558_v22 = vld [vmem:[#allocation2 + $0x28c] ss:$16 sps:$4 sm:$0xff]   ;;  %v3553_v23 = vld [vmem:[#allocation2 + $0x280] ss:$16 sps:$4 sm:$0xff]  }
 0x5c1   :  { %v1620_v16 = vmul.f32 %v1619_v24, %v1612_v15  ;;  %v1622_v26 = vmul.f32 %v1619_v24, %v1591_v60  ;;  %v3517_v60 = vld [vmem:[#allocation2 + $0x1c0] ss:$16 sps:$4 sm:$0xff]   ;;  %v3544_v15 = vld [vmem:[#allocation2 + $0x248] ss:$16 sps:$4 sm:$0xff]  }
 0x5c2   :  { %2274 = vmatpush1.bf16.msra.mxu0 %v3517_v60  ;;  %v3556_v24 = vld [vmem:[#allocation2 + $0x288] ss:$16 sps:$4 sm:$0xff]  }
 0x5c3   :  { %v1621_v25 = vsub.f32 %v1598_v2, %v1620_v16  ;;  %2275 = vmatprep.subr.bf16.mxu0 %v3525_v1  ;;  %v3561_v2 = vld [vmem:[#allocation2 + $0x2a4] ss:$16 sps:$4 sm:$0xff]   ;;  %v3564_v16 = vld [vmem:[#allocation2 + $0x2ac] ss:$16 sps:$4 sm:$0xff]  }
 0x5c5   :  { %v1623_v27 = vadd.f32 %v1622_v26, %v1621_v25  ;;  %v3559_v25 = vld [vmem:[#allocation2 + $0x2a0] ss:$16 sps:$4 sm:$0xff]   ;;  %v3562_v26 = vld [vmem:[#allocation2 + $0x2a8] ss:$16 sps:$4 sm:$0xff]  }
 0x5c6   :  { %2276 = vmatpush1.bf16.msra.mxu0 %v3523_v7 }
 0x5c7   :  { %v1624_v28 = vmax.f32 %v1623_v27, 0.0  ;;  %2277 = vmatprep.subr.bf16.mxu0 %v3531_v9  ;;  %v3567_v27 = vld [vmem:[#allocation2 + $0x2c4] ss:$16 sps:$4 sm:$0xff]  }
 0x5c9   :  { %v1625_v29 = vpack.c.bf16 %v1624_v28, %v1624_v28  ;;  %v3570_v28 = vld [vmem:[#allocation2 + $0x2cc] ss:$16 sps:$4 sm:$0xff]  }
 0x5ca   :  { %2278 = vmatpush1.bf16.msra.mxu0 %v3529_v13 }
 0x5cb   :  { %1755 = vmatmul.mubr.bf16.vlgmr.msra.gmra.mrb[16].mxu1 %v1625_v29  ;;  %2279 = vmatprep.subr.bf16.mxu0 %v3537_v6  ;;  %v3565_v29 = vld [vmem:[#allocation2 + $0x2c0] ss:$16 sps:$4 sm:$0xff]  }
 0x5cc   :  { %2303 = vmatpush1.bf16.msra.mxu1 %v3484_v33  ;;  %v3571_v33 = vld [vmem:[#allocation2 + $0x2e0] ss:$16 sps:$4 sm:$0xff]  }
 0x5cd   :  { %2304 = vmatprep.subr.bf16.mxu1 %v3492_v35 }
 0x5ce   :  { %2280 = vmatpush1.bf16.msra.mxu0 %v3535_v61 }
 0x5cf   :  { %2281 = vmatprep.subr.bf16.mxu0 %v3543_v4 }
 0x5d0   :  { %2305 = vmatpush1.bf16.msra.mxu1 %v3490_v38 }
 0x5d1   :  { %2306 = vmatprep.subr.bf16.mxu1 %v3498_v40 }
 0x5d2   :  { %2282 = vmatpush1.bf16.msra.mxu0 %v3541_v14 }
 0x5d3   :  { %2283 = vmatprep.subr.bf16.mxu0 %v3549_v17 }
 0x5d4   :  { %2307 = vmatpush1.bf16.msra.mxu1 %v3496_v42 }
 0x5d5   :  { %2308 = vmatprep.subr.bf16.mxu1 %v3504_v44 }
 0x5d6   :  { %2284 = vmatpush1.bf16.msra.mxu0 %v3547_v19 }
 0x5d7   :  { %2285 = vmatprep.subr.bf16.mxu0 %v3555_v21 }
 0x5d8   :  { %2309 = vmatpush1.bf16.msra.mxu1 %v3502_v50 }
 0x5d9   :  { %2310 = vmatprep.subr.bf16.mxu1 %v3510_v52 }
 0x5da   :  { %2286 = vmatpush1.bf16.msra.mxu0 %v3553_v23 }
 0x5db   :  { %2287 = vmatprep.subr.bf16.mxu0 %v3561_v2 }
 0x5dc   :  { %2311 = vmatpush1.bf16.msra.mxu1 %v3508_v54 }
 0x5dd   :  { %2312 = vmatprep.subr.bf16.mxu1 %v3516_v55 }
 0x5de   :  { %2288 = vmatpush1.bf16.msra.mxu0 %v3559_v25 }
 0x5df   :  { %2289 = vmatprep.subr.bf16.mxu0 %v3567_v27 }
 0x5e0   :  { %2313 = vmatpush1.bf16.msra.mxu1 %v3514_v57 }
 0x5e1   :  { %2314 = vmatprep.subr.bf16.mxu1 %v3522_v59 }
 0x5e2   :  { %2290 = vmatpush1.bf16.msra.mxu0 %v3565_v29 }
 0x5e3   :  { %2291 = vmatprep.subr.bf16.mxu0 %v3573_v31 }
 0x5e4   :  { %2315 = vmatpush1.bf16.msra.mxu1 %v3520_v62 }
 0x5e5   :  { %2316 = vmatprep.subr.bf16.mxu1 %v3528_v3 }
 0x5e6   :  { %2292 = vmatpush1.bf16.msra.mxu0 %v3571_v33  ;;  %v1766_v33 = vld [vmem:[#allocation7 + $0x22] ss:$8 sm:$0x3] }
 0x5e8   :  { %2317 = vmatpush1.bf16.msra.mxu1 %v3526_v8 }
 0x5e9   :  { %2318 = vmatprep.subr.bf16.mxu1 %v3534_v12 }
 0x5ec   :  { %2319 = vmatpush1.bf16.msra.mxu1 %v3532_v63 }
 0x5ed   :  { %2320 = vmatprep.subr.bf16.mxu1 %v3540_v11 }
 0x5f0   :  { %2321 = vmatpush1.bf16.msra.mxu1 %v3538_v10 }
 0x5f1   :  { %2322 = vmatprep.subr.bf16.mxu1 %v3546_v5 }
 0x5f4   :  { %2323 = vmatpush1.bf16.msra.mxu1 %v3544_v15 }
 0x5f5   :  { %2324 = vmatprep.subr.bf16.mxu1 %v3552_v18 }
 0x5f8   :  { %2325 = vmatpush1.bf16.msra.mxu1 %v3550_v20 }
 0x5f9   :  { %2326 = vmatprep.subr.bf16.mxu1 %v3558_v22 }
 0x5fc   :  { %2327 = vmatpush1.bf16.msra.mxu1 %v3556_v24  ;;  %v1764_v24 = vld [vmem:[#allocation7 + $0x21] ss:$8 sm:$0x3] }
 0x5fd   :  { %2328 = vmatprep.subr.bf16.mxu1 %v3564_v16 }
 0x600   :  { %2329 = vmatpush1.bf16.msra.mxu1 %v3562_v26 }
 0x601   :  { %2330 = vmatprep.subr.bf16.mxu1 %v3570_v28 }
 0x604   :  { %2331 = vmatpush1.bf16.msra.mxu1 %v3568_v30 }
 0x605   :  { %2332 = vmatprep.subr.bf16.mxu1 %v3576_v32 }
 0x608   :  { %2333 = vmatpush1.bf16.msra.mxu1 %v3574_v34 }
 0x69e   :  { %v1756_v35 = vpop.f32.mrb[16].mxu1 }
 0x69f   :  { %v1767_v37 = vrot.slane %v1756_v35, 4  ;;  %v1779_v38 = vmul.f32 %v1756_v35, %v1756_v35  ;;  %v1758_v39 = vpop.f32.mrb[17].mxu1 }
 0x6a0   :  { %v1773_v40 = vrot.slane %v1758_v39, 4  ;;  %v1780_v41 = vmul.f32 %v1758_v39, %v1758_v39  ;;  %v1760_v42 = vpop.f32.mrb[18].mxu1 }
 0x6a1   :  { %v1768_v43 = vadd.f32 %v1767_v37, %v1756_v35  ;;  %v1781_v44 = vrot.slane %v1779_v38, 4  ;;  %v1761_v46 = vpop.f32.mrb[19].mxu1 }
 0x6a2   :  { %v1774_v50 = vadd.f32 %v1773_v40, %v1758_v39  ;;  %v1787_v51 = vrot.slane %v1780_v41, 4 }
 0x6a3   :  { %v1769_v52 = vrot.slane %v1768_v43, 2  ;;  %v1782_v53 = vadd.f32 %v1781_v44, %v1779_v38 }
 0x6a4   :  { %v1775_v54 = vrot.slane %v1774_v50, 2  ;;  %v1788_v0 = vadd.f32 %v1787_v51, %v1780_v41  ;;  %v3579_v51 = vld [vmem:[#allocation6 + $0xc0] sm:$0xff]  }
 0x6a5   :  { %v1770_v55 = vadd.f32 %v1769_v52, %v1768_v43  ;;  %v1783_v56 = vrot.slane %v1782_v53, 2  ;;  %v3580_v52 = vld [vmem:[#allocation6 + $0x140] sm:$0xff]  }
 0x6a6   :  { %v1776_v57 = vadd.f32 %v1775_v54, %v1774_v50  ;;  %v1789_v58 = vrot.slane %v1788_v0, 2  ;;  %v3582_v54 = vld [vmem:[#allocation6 + $0x188] sm:$0xff]  }
 0x6a7   :  { %v1771_v59 = vrot.slane %v1770_v55, 1  ;;  %v1784_v60 = vadd.f32 %v1783_v56, %v1782_v53  ;;  %v3581_v53 = vld [vmem:[#allocation6 + $0x108] sm:$0xff]   ;;  %v3585_v56 = vld [vmem:[#allocation6 + $0x110] sm:$0xff]  }
 0x6a8   :  { %v1777_v62 = vrot.slane %v1776_v57, 1  ;;  %v1790_v1 = vadd.f32 %v1789_v58, %v1788_v0  ;;  %v3583_v0 = vld [vmem:[#allocation6 + $0xc8] sm:$0xff]   ;;  %v3587_v58 = vld [vmem:[#allocation6 + $0xd0] sm:$0xff]  }
 0x6a9   :  { %v1772_v3 = vadd.f32 %v1771_v59, %v1770_v55  ;;  %v1785_v7 = vrot.slane %v1784_v60, 1  ;;  %v3584_v55 = vld [vmem:[#allocation6 + $0x148] sm:$0xff]   ;;  %v3588_v59 = vld [vmem:[#allocation6 + $0x150] sm:$0xff]  }
 0x6aa   :  { %v1778_v8 = vadd.f32 %v1777_v62, %v1776_v57  ;;  %v1791_v9 = vrot.slane %v1790_v1, 1  ;;  %v3586_v57 = vld [vmem:[#allocation6 + $0x190] sm:$0xff]   ;;  %v3590_v62 = vld [vmem:[#allocation6 + $0x198] sm:$0xff]  }
 0x6ab   :  { %v1786_v12 = vadd.f32 %v1785_v7, %v1784_v60  ;;  %v1793_v13 = vmul.f32 0.125, %v1772_v3  ;;  %v3589_v60 = vld [vmem:[#allocation6 + $0x118] sm:$0xff]   ;;  %v3593_v7 = vld [vmem:[#allocation6 + $0x120] sm:$0xff]  }
 0x6ac   :  { %v1792_v63 = vadd.f32 %v1791_v9, %v1790_v1  ;;  %v1794_v6 = vmul.f32 0.125, %v1778_v8  ;;  %v3591_v1 = vld [vmem:[#allocation6 + $0xd8] sm:$0xff]   ;;  %v3594_v8 = vld [vmem:[#allocation6 + $0x1a0] sm:$0xff]  }
 0x6ad   :  { %v1795_v11 = vmul.f32 0.125, %v1786_v12  ;;  %v1797_v61 = vmul.f32 %v1793_v13, %v1793_v13  ;;  %v3592_v3 = vld [vmem:[#allocation6 + $0x158] sm:$0xff]   ;;  %v3595_v9 = vld [vmem:[#allocation6 + $0xe0] sm:$0xff]  }
 0x6ae   :  { %v1796_v10 = vmul.f32 0.125, %v1792_v63  ;;  %v1798_v4 = vmul.f32 %v1794_v6, %v1794_v6  ;;  %v3596_v12 = vld [vmem:[#allocation6 + $0x160] sm:$0xff]   ;;  %v3598_v63 = vld [vmem:[#allocation6 + $0x1a8] sm:$0xff]  }
 0x6af   :  { %v1799_v5 = vsub.f32 %v1795_v11, %v1797_v61  ;;  %v3600_v11 = vld [vmem:[#allocation6 + $0x168] sm:$0xff]   ;;  %v3601_v61 = vld [vmem:[#allocation6 + $0x130] sm:$0xff]  }
 0x6b0   :  { %v1800_v14 = vsub.f32 %v1796_v10, %v1798_v4  ;;  %v3602_v10 = vld [vmem:[#allocation6 + $0x1b0] sm:$0xff]  }
 0x6b1   :  { %v1801_v15 = vmax.f32 %v1799_v5, 0.0  ;;  %v3603_v4 = vld [vmem:[#allocation6 + $0xf0] sm:$0xff]  }
 0x6b2   :  { %v1802_v17 = vmax.f32 %v1800_v14, 0.0  ;;  %v3604_v5 = vld [vmem:[#allocation6 + $0x170] sm:$0xff]   ;;  %v3605_v14 = vld [vmem:[#allocation6 + $0x138] sm:$0xff]  }
 0x6b3   :  { %v1803_v18 = vadd.f32 1e-05, %v1801_v15  ;;  %v3606_v15 = vld [vmem:[#allocation6 + $0x1b8] sm:$0xff]  }
 0x6b4   :  { %v1804_v19 = vadd.f32 1e-05, %v1802_v17  ;;  %v3607_v17 = vld [vmem:[#allocation6 + $0xf8] sm:$0xff]  }
 0x6b5   :  { %3627 = vrsqrt.f32 %v1803_v18  ;;  %v3608_v18 = vld [vmem:[#allocation6 + $0x178] sm:$0xff]  }
 0x6b6   :  { %3629 = vrsqrt.f32 %v1804_v19 }
 0x6bf   :  { %v3628_v20 = vpop.eup %3627 }
 0x6c0   :  { %v3630_v21 = vpop.eup %3629 }
 0x6c1   :  { %v1809_v22 = vcombine.low %v3628_v20, %v3630_v21 }
 0x6c3   :  { %v1816_v23 = vrot.slane %v1809_v22, %v3865_v36 }
 0x6c5   :  { %v1823_v2 = vrot.slane %v1816_v23, %v3865_v36 }
 0x6c7   :  { %v1825_v16 = vmul.f32 %v1823_v2, %v1764_v24 }
 0x6c9   :  { %v1830_v25 = vrot.slane %v1825_v16, %v3869_v45  ;;  %v1834_v26 = vrot.slane %v1825_v16, %v3872_v47 }
 0x6cb   :  { %v1837_v27 = vmul.f32 %v1830_v25, %v1793_v13  ;;  %v1838_v28 = vmul.f32 %v1834_v26, %v1794_v6  ;;  %v1859_v29 = vmul.f32 %v1834_v26, %v1758_v39  ;;  %v1858_v30 = vmul.f32 %v1830_v25, %v1756_v35  ;;  %v3577_v35 = vld [vmem:[#allocation6 + $0x100] sm:$0xff]   ;;  %v3597_v13 = vld [vmem:[#allocation6 + $0x128] sm:$0xff]  }
 0x6cc   :  { %v3578_v39 = vld [vmem:[#allocation6 + $0x180] sm:$0xff]   ;;  %3181 = vmatprep.subr.bf16.mxu0 %v3577_v35  ;;  %v3599_v6 = vld [vmem:[#allocation6 + $0xe8] sm:$0xff]  }
 0x6cd   :  { %v1841_v31 = vcombine.low %v1837_v27, %v1838_v28  ;;  %3203 = vmatprep.subr.bf16.mxu1 %v3578_v39 }
 0x6cf   :  { %v1848_v32 = vrot.slane %v1841_v31, %v3865_v36 }
 0x6d1   :  { %v1855_v34 = vrot.slane %v1848_v32, %v3865_v36 }
 0x6d3   :  { %v1857_v37 = vsub.f32 %v1766_v33, %v1855_v34 }
 0x6d5   :  { %v1868_v38 = vrot.slane %v1857_v37, %v3872_v47  ;;  %v1864_v40 = vrot.slane %v1857_v37, %v3869_v45 }
 0x6d7   :  { %v1872_v41 = vadd.f32 %v1868_v38, %v1859_v29  ;;  %v1871_v42 = vadd.f32 %v1864_v40, %v1858_v30 }
 0x6d9   :  { %v1874_v43 = vmax.f32 %v1872_v41, 0.0  ;;  %v1873_v44 = vmax.f32 %v1871_v42, 0.0 }
 0x6db   :  { %v1876_v46 = vpack.c.bf16 %v1874_v43, %v1874_v43  ;;  %v1875_v50 = vpack.c.bf16 %v1873_v44, %v1873_v44 }
 0x6dd   :  { %2293 = vmatprep.mubr.bf16.mxu0 %v1876_v46  ;;  %2334 = vmatprep.mubr.bf16.mxu1 %v1876_v46 }
 0x6de   :  { %2294 = vmatmul.mubr.bf16.vlgmr.msra.gmra.mrb[8].mxu0 %v1875_v50  ;;  %2335 = vmatmul.mubr.bf16.vlgmr.msra.gmra.mrb[20].mxu1 %v1875_v50 }
 0x6df   :  { %3182 = vmatpush3.bf16.msra.mxu0 %v3579_v51  ;;  %3204 = vmatpush3.bf16.msra.mxu1 %v3580_v52 }
 0x6e0   :  { %3183 = vmatprep.subr.bf16.mxu0 %v3581_v53  ;;  %3205 = vmatprep.subr.bf16.mxu1 %v3582_v54 }
 0x6e3   :  { %3184 = vmatpush3.bf16.msra.mxu0 %v3583_v0  ;;  %3206 = vmatpush3.bf16.msra.mxu1 %v3584_v55 }
 0x6e4   :  { %3185 = vmatprep.subr.bf16.mxu0 %v3585_v56  ;;  %3207 = vmatprep.subr.bf16.mxu1 %v3586_v57 }
 0x6e7   :  { %3186 = vmatpush3.bf16.msra.mxu0 %v3587_v58  ;;  %3208 = vmatpush3.bf16.msra.mxu1 %v3588_v59 }
 0x6e8   :  { %3187 = vmatprep.subr.bf16.mxu0 %v3589_v60  ;;  %3209 = vmatprep.subr.bf16.mxu1 %v3590_v62 }
 0x6eb   :  { %3188 = vmatpush3.bf16.msra.mxu0 %v3591_v1  ;;  %3210 = vmatpush3.bf16.msra.mxu1 %v3592_v3 }
 0x6ec   :  { %3189 = vmatprep.subr.bf16.mxu0 %v3593_v7  ;;  %3211 = vmatprep.subr.bf16.mxu1 %v3594_v8 }
 0x6ef   :  { %3190 = vmatpush3.bf16.msra.mxu0 %v3595_v9  ;;  %3212 = vmatpush3.bf16.msra.mxu1 %v3596_v12 }
 0x6f0   :  { %3191 = vmatprep.subr.bf16.mxu0 %v3597_v13  ;;  %3213 = vmatprep.subr.bf16.mxu1 %v3598_v63 }
 0x6f3   :  { %3192 = vmatpush3.bf16.msra.mxu0 %v3599_v6  ;;  %3214 = vmatpush3.bf16.msra.mxu1 %v3600_v11 }
 0x6f4   :  { %3193 = vmatprep.subr.bf16.mxu0 %v3601_v61  ;;  %3215 = vmatprep.subr.bf16.mxu1 %v3602_v10 }
 0x6f7   :  { %3194 = vmatpush3.bf16.msra.mxu0 %v3603_v4  ;;  %3216 = vmatpush3.bf16.msra.mxu1 %v3604_v5 }
 0x6f8   :  { %3195 = vmatprep.subr.bf16.mxu0 %v3605_v14  ;;  %3217 = vmatprep.subr.bf16.mxu1 %v3606_v15 }
 0x6fb   :  { %3196 = vmatpush3.bf16.msra.mxu0 %v3607_v17  ;;  %3218 = vmatpush3.bf16.msra.mxu1 %v3608_v18 }
 0x7b1   :  { %v3922_v19 = vpop.f32.mrb[8].mxu0  ;;  %v3924_v20 = vpop.f32.mrb[20].mxu1 }
 0x7b2   :  { %v2347_v21 = vrot.slane %v3922_v19, 4  ;;  %v2371_v22 = vmul.f32 %v3922_v19, %v3922_v19  ;;  %v2359_v23 = vrot.slane %v3924_v20, 4  ;;  %v2373_v24 = vmul.f32 %v3924_v20, %v3924_v20  ;;  %v3932_v2 = vpop.f32.mrb[9].mxu0  ;;  %v3934_v16 = vpop.f32.mrb[21].mxu1 }
 0x7b3   :  { %v2353_v25 = vrot.slane %v3932_v2, 4  ;;  %v2372_v26 = vmul.f32 %v3932_v2, %v3932_v2  ;;  %v2365_v27 = vrot.slane %v3934_v16, 4  ;;  %v2374_v28 = vmul.f32 %v3934_v16, %v3934_v16  ;;  %v2299_v29 = vpop.f32.mrb[10].mxu0  ;;  %v2340_v30 = vpop.f32.mrb[22].mxu1 }
 0x7b4   :  { %v2348_v31 = vadd.f32 %v2347_v21, %v3922_v19  ;;  %v2375_v32 = vrot.slane %v2371_v22, 4  ;;  %v2360_v33 = vadd.f32 %v2359_v23, %v3924_v20  ;;  %v2387_v34 = vrot.slane %v2373_v24, 4  ;;  %v2300_v37 = vpop.f32.mrb[11].mxu0  ;;  %v2341_v38 = vpop.f32.mrb[23].mxu1 }
 0x7b5   :  { %v2354_v40 = vadd.f32 %v2353_v25, %v3932_v2  ;;  %v2381_v41 = vrot.slane %v2372_v26, 4  ;;  %v2366_v42 = vadd.f32 %v2365_v27, %v3934_v16  ;;  %v2393_v43 = vrot.slane %v2374_v28, 4 }
 0x7b6   :  { %v2349_v44 = vrot.slane %v2348_v31, 2  ;;  %v2376_v46 = vadd.f32 %v2375_v32, %v2371_v22  ;;  %v2361_v50 = vrot.slane %v2360_v33, 2  ;;  %v2388_v35 = vadd.f32 %v2387_v34, %v2373_v24 }
 0x7b7   :  { %v2355_v39 = vrot.slane %v2354_v40, 2  ;;  %v2382_v51 = vadd.f32 %v2381_v41, %v2372_v26  ;;  %v2367_v52 = vrot.slane %v2366_v42, 2  ;;  %v2394_v53 = vadd.f32 %v2393_v43, %v2374_v28 }
 0x7b8   :  { %v2350_v54 = vadd.f32 %v2349_v44, %v2348_v31  ;;  %v2377_v0 = vrot.slane %v2376_v46, 2  ;;  %v2362_v55 = vadd.f32 %v2361_v50, %v2360_v33  ;;  %v2389_v56 = vrot.slane %v2388_v35, 2 }
 0x7b9   :  { %v2356_v57 = vadd.f32 %v2355_v39, %v2354_v40  ;;  %v2383_v58 = vrot.slane %v2382_v51, 2  ;;  %v2368_v59 = vadd.f32 %v2367_v52, %v2366_v42  ;;  %v2395_v60 = vrot.slane %v2394_v53, 2 }
 0x7ba   :  { %v2351_v62 = vrot.slane %v2350_v54, 1  ;;  %v2378_v1 = vadd.f32 %v2377_v0, %v2376_v46  ;;  %v2363_v3 = vrot.slane %v2362_v55, 1  ;;  %v2390_v7 = vadd.f32 %v2389_v56, %v2388_v35 }
 0x7bb   :  { %v2357_v8 = vrot.slane %v2356_v57, 1  ;;  %v2384_v9 = vadd.f32 %v2383_v58, %v2382_v51  ;;  %v2369_v12 = vrot.slane %v2368_v59, 1  ;;  %v2396_v13 = vadd.f32 %v2395_v60, %v2394_v53 }
 0x7bc   :  { %v2352_v63 = vadd.f32 %v2351_v62, %v2350_v54  ;;  %v2379_v6 = vrot.slane %v2378_v1, 1  ;;  %v2364_v11 = vadd.f32 %v2363_v3, %v2362_v55  ;;  %v2391_v61 = vrot.slane %v2390_v7, 1 }
 0x7bd   :  { %v2358_v10 = vadd.f32 %v2357_v8, %v2356_v57  ;;  %v2385_v4 = vrot.slane %v2384_v9, 1  ;;  %v2370_v5 = vadd.f32 %v2369_v12, %v2368_v59  ;;  %v2397_v14 = vrot.slane %v2396_v13, 1  ;;  %v2344_v59 = vld [vmem:[#allocation7 + $0x23] ss:$8 sm:$0xf] }
 0x7be   :  { %v2380_v15 = vadd.f32 %v2379_v6, %v2378_v1  ;;  %v2399_v17 = vmul.f32 0.125, %v2352_v63  ;;  %v2392_v18 = vadd.f32 %v2391_v61, %v2390_v7  ;;  %v2401_v21 = vmul.f32 0.125, %v2364_v11 }
 0x7bf   :  { %v2386_v22 = vadd.f32 %v2385_v4, %v2384_v9  ;;  %v2400_v23 = vmul.f32 0.125, %v2358_v10  ;;  %v2398_v24 = vadd.f32 %v2397_v14, %v2396_v13  ;;  %v2402_v25 = vmul.f32 0.125, %v2370_v5 }
 0x7c0   :  { %v2403_v26 = vmul.f32 0.125, %v2380_v15  ;;  %v2407_v27 = vmul.f32 %v2399_v17, %v2399_v17  ;;  %v2405_v28 = vmul.f32 0.125, %v2392_v18  ;;  %v2409_v29 = vmul.f32 %v2401_v21, %v2401_v21 }
 0x7c1   :  { %v2404_v30 = vmul.f32 0.125, %v2386_v22  ;;  %v2408_v31 = vmul.f32 %v2400_v23, %v2400_v23  ;;  %v2406_v32 = vmul.f32 0.125, %v2398_v24  ;;  %v2410_v33 = vmul.f32 %v2402_v25, %v2402_v25  ;;  %v2346_v22 = vld [vmem:[#allocation7 + $0x24] ss:$8 sm:$0xf] }
 0x7c2   :  { %v2411_v34 = vsub.f32 %v2403_v26, %v2407_v27  ;;  %v2413_v37 = vsub.f32 %v2405_v28, %v2409_v29 }
 0x7c3   :  { %v2412_v38 = vsub.f32 %v2404_v30, %v2408_v31  ;;  %v2414_v40 = vsub.f32 %v2406_v32, %v2410_v33 }
 0x7c4   :  { %v2415_v41 = vmax.f32 %v2411_v34, 0.0  ;;  %v2417_v42 = vmax.f32 %v2413_v37, 0.0 }
 0x7c5   :  { %v2416_v43 = vmax.f32 %v2412_v38, 0.0  ;;  %v2418_v44 = vmax.f32 %v2414_v40, 0.0 }
 0x7c6   :  { %v2419_v46 = vadd.f32 1e-05, %v2415_v41  ;;  %v2421_v50 = vadd.f32 1e-05, %v2417_v42 }
 0x7c7   :  { %v2420_v35 = vadd.f32 1e-05, %v2416_v43  ;;  %v2422_v39 = vadd.f32 1e-05, %v2418_v44 }
 0x7c8   :  { %3631 = vrsqrt.f32 %v2419_v46 }
 0x7c9   :  { %3633 = vrsqrt.f32 %v2421_v50 }
 0x7ca   :  { %3635 = vrsqrt.f32 %v2420_v35 }
 0x7cb   :  { %3637 = vrsqrt.f32 %v2422_v39 }
 0x7d2   :  { %v3632_v51 = vpop.eup %3631 }
 0x7d3   :  { %v3634_v52 = vpop.eup %3633 }
 0x7d4   :  { %v3636_v53 = vpop.eup %3635 }
 0x7d5   :  { %v3638_v54 = vpop.eup %3637  ;;  %v2431_v0 = vcombine.low %v3632_v51, %v3636_v53 }
 0x7d6   :  { %v2432_v55 = vcombine.low %v3634_v52, %v3638_v54 }
 0x7d7   :  { %v2439_v56 = vrot.slane %v2431_v0, %v3865_v36 }
 0x7d8   :  { %v2446_v57 = vrot.slane %v2432_v55, %v3865_v36 }
 0x7da   :  { %v2447_v58 = vcombine.low %v2439_v56, %v2446_v57 }
 0x7dc   :  { %v2454_v60 = vrot.slane %v2447_v58, %v3865_v36 }
 0x7de   :  { %v2456_v62 = vmul.f32 %v2454_v60, %v2344_v59 }
 0x7e0   :  { %v2469_v1 = vrot.slane %v2456_v62, %v3874_v48  ;;  %v2473_v3 = vrot.slane %v2456_v62, %v3876_v49  ;;  %v2461_v7 = vrot.slane %v2456_v62, %v3869_v45  ;;  %v2465_v8 = vrot.slane %v2456_v62, %v3872_v47 }
 0x7e2   :  { %v2480_v9 = vmul.f32 %v2469_v1, %v2401_v21  ;;  %v2481_v12 = vmul.f32 %v2473_v3, %v2402_v25  ;;  %v2515_v13 = vmul.f32 %v2473_v3, %v3934_v16  ;;  %v2478_v63 = vmul.f32 %v2461_v7, %v2399_v17 }
 0x7e3   :  { %v2479_v6 = vmul.f32 %v2465_v8, %v2400_v23  ;;  %v2513_v11 = vmul.f32 %v2465_v8, %v3932_v2  ;;  %v2512_v61 = vmul.f32 %v2461_v7, %v3922_v19  ;;  %v2514_v10 = vmul.f32 %v2469_v1, %v3924_v20 }
 0x7e4   :  { %v2487_v4 = vcombine.low %v2480_v9, %v2481_v12 }
 0x7e5   :  { %v2486_v5 = vcombine.low %v2478_v63, %v2479_v6 }
 0x7e6   :  { %v2501_v14 = vrot.slane %v2487_v4, %v3865_v36 }
 0x7e7   :  { %v2494_v15 = vrot.slane %v2486_v5, %v3865_v36 }
 0x7e9   :  { %v2502_v18 = vcombine.low %v2494_v15, %v2501_v14 }
 0x7eb   :  { %v2509_v21 = vrot.slane %v2502_v18, %v3865_v36 }
 0x7ed   :  { %v2511_v24 = vsub.f32 %v2346_v22, %v2509_v21 }
 0x7ef   :  { %v2524_v16 = vrot.slane %v2511_v24, %v3872_v47  ;;  %v2532_v17 = vrot.slane %v2511_v24, %v3876_v49  ;;  %v2520_v2 = vrot.slane %v2511_v24, %v3869_v45  ;;  %v2528_v19 = vrot.slane %v2511_v24, %v3874_v48  ;;  %v2613_v49 = vld [vmem:[#allocation7 + $0x25] ss:$0 sm:$0xff] }
 0x7f1   :  { %v2538_v20 = vadd.f32 %v2524_v16, %v2513_v11  ;;  %v2540_v23 = vadd.f32 %v2532_v17, %v2515_v13  ;;  %v2537_v25 = vadd.f32 %v2520_v2, %v2512_v61  ;;  %v2539_v26 = vadd.f32 %v2528_v19, %v2514_v10 }
 0x7f3   :  { %v2542_v27 = vmax.f32 %v2538_v20, 0.0  ;;  %v2544_v28 = vmax.f32 %v2540_v23, 0.0  ;;  %v2541_v29 = vmax.f32 %v2537_v25, 0.0  ;;  %v2543_v30 = vmax.f32 %v2539_v26, 0.0 }
 0x7f5   :  { %v2546_v31 = vpack.c.bf16 %v2542_v27, %v2542_v27  ;;  %v2548_v32 = vpack.c.bf16 %v2544_v28, %v2544_v28  ;;  %v2545_v36 = vpack.c.bf16 %v2541_v29, %v2541_v29  ;;  %v2547_v33 = vpack.c.bf16 %v2543_v30, %v2543_v30 }
 0x7f7   :  { %2838 = vmatprep.mubr.bf16.mxu0 %v2546_v31  ;;  %2878 = vmatprep.mubr.bf16.mxu1 %v2548_v32 }
 0x7f8   :  { %2839 = vmatmul.mubr.bf16.vlgmr.msra.gmra.mrb[12].mxu0 %v2545_v36  ;;  %2879 = vmatmul.mubr.bf16.vlgmr.msra.gmra.mrb[24].mxu1 %v2547_v33 }
 0x8cb   :  { %v3197_v47 = vpop.f32.mrb[12].mxu0  ;;  %v3219_v45 = vpop.f32.mrb[24].mxu1 }
 0x8cc   :  { %v3198_v48 = vpop.f32.mrb[13].mxu0  ;;  %v3220_v34 = vpop.f32.mrb[25].mxu1 }
 0x8cd   :  { %v3199_v37 = vadd.f32 %v3198_v48, %v3197_v47  ;;  %v3221_v38 = vadd.f32 %v3220_v34, %v3219_v45  ;;  %v3200_v40 = vpop.f32.mrb[14].mxu0  ;;  %v3222_v41 = vpop.f32.mrb[26].mxu1 }
 0x8ce   :  { %v3201_v42 = vpop.f32.mrb[15].mxu0  ;;  %v3223_v43 = vpop.f32.mrb[27].mxu1 }
 0x8cf   :  { %v2841_v44 = vadd.f32 %v3199_v37, %v2613_v49 }
 0x8d1   :  { %v2881_v46 = vadd.f32 %v3221_v38, %v2841_v44 }
 0x8d3   :  { %v3149_v50 = vmul.f32 -1.442695, %v2881_v46 }
 0x8d5   :  { %3639 = vpow2.f32 %v3149_v50 }
 0x8df   :  { %v3640_v35 = vpop.eup %3639 }
 0x8e0   :  { %v2889_v39 = vadd.f32 1.0, %v3640_v35 }
 0x8e2   :  { %3641 = vrcp.f32 %v2889_v39 }
 0x8ec   :  { %v3642_v51 = vpop.eup %3641 }
 0x8ed   :  { %2892 = vst [vmem:[%s3973_s6] sm:$0xff] %v3642_v51 }
 0x8ee   :  { %2898 = vsyncpa [#allocation3], 1 }
 0x8ef   :  { %2899 = vsyncpa [#allocation5], 1 }
 0x8f0   :  { %2900 = vsyncpa [#allocation8], 1 }

</bundles_post_ra>
